<compile_context>
chip_gen: v6e
topology: v6e:2x2x1
jax: 0.10.0
libtpu: 0.0.40
codegen_flags: <defaults>
</compile_context>

<pallas_src>
import functools
import math

import jax
import jax.numpy as jnp
from jax.experimental import pallas as pl
from jax.experimental.pallas import tpu as pltpu

D_MODEL = 32
N_HEADS = 4
D_K = D_MODEL // N_HEADS
D_FF = 64
EPS = 1e-6
_VEC_LANES = 128  # one packed (8, 128) slab holds all bias / LayerNorm vectors


def _layernorm(x, a, b, eps=EPS):
    # PyTorch reference: mean over last dim, *unbiased* std (N-1), divide by (std + eps).
    d = x.shape[-1]
    mean = jnp.mean(x, axis=-1, keepdims=True)
    var = jnp.sum((x - mean) ** 2, axis=-1, keepdims=True) * (1.0 / (d - 1))
    std = jnp.sqrt(var)
    inv = pl.reciprocal(std + eps, approx=True)  # EUP slot; nearly free vs VPU divide
    return a * (x - mean) * inv + b


def encoder_layer_kernel(x_ref, bias_ref, wattn_ref, w1_ref, w2_ref, vec_ref,
                         out_ref, *, matmul_dtype):
    bt, s, d = x_ref.shape
    f32 = jnp.float32

    x = x_ref[...].astype(f32)                       # (BT, S, D)
    xf = x.reshape(bt * s, d)                        # fold batch into matmul M dim (free)

    # ---- unpack packed parameter slabs (static slices, no extra DMAs) ----
    wattn = wattn_ref[...]                           # (D, 4D) = [wq*scale | wk | wv | wo]
    wo = wattn[:, 3 * d:]                            # (D, D), already matmul_dtype
    w1 = w1_ref[...]                                 # (D, D_FF), matmul_dtype
    w2 = w2_ref[...]                                 # (D_FF, D), matmul_dtype
    vecs = vec_ref[...]                              # (8, 128) f32
    bqkv = vecs[0:1, :]                              # (1, 128): [bq*scale | bk | bv | 0]
    bo = vecs[1:2, :d]
    b1 = vecs[2:3, :D_FF]
    b2 = vecs[3:4, :d]
    ln1a, ln1b = vecs[4:5, :d], vecs[5:6, :d]
    ln2a, ln2b = vecs[6:7, :d], vecs[7:8, :d]

    # mask hoisted: head-independent additive bias, broadcast ONCE to the stacked
    # (H*BT, S, S) score layout (no per-head broadcast replication).
    bias = bias_ref[...].astype(f32)                 # (BT, S) of {0, -1e9}
    bias_b = jnp.broadcast_to(bias[:, None, :], (bt, s, s))
    bias_stack = jnp.concatenate([bias_b] * N_HEADS, axis=0)   # (H*BT, S, S)

    # ---------- sublayer 0: x + SelfAttention(LayerNorm(x)) ----------
    nx1 = _layernorm(xf, ln1a, ln1b)
    # fused Q/K/V projection against the full lane-dense (D, 128) slab; the last 32
    # output lanes (nx @ wo) are discarded — same MXU pass width either way.
    qkv = jnp.dot(nx1.astype(matmul_dtype), wattn,
                  preferred_element_type=f32) + bqkv            # (M, 128)
    q = qkv[:, :d].reshape(bt, s, d)
    k = qkv[:, d:2 * d].reshape(bt, s, d)
    v = qkv[:, 2 * d:3 * d].reshape(bt, s, d)

    def head_stack(t):   # (BT, S, D) -> (H*BT, S, D_K): heads merged into the batch dim
        return jnp.concatenate(
            [t[:, :, h * D_K:(h + 1) * D_K] for h in range(N_HEADS)], axis=0)

    qs = head_stack(q).astype(matmul_dtype)          # one cast each, not per head
    ks = head_stack(k).astype(matmul_dtype)
    vs = head_stack(v).astype(matmul_dtype)

    # single batched score matmul / bias add / softmax for all heads
    # (1/sqrt(d_k) is folded into wq & bq at pack time).
    scores = jnp.einsum("bqd,bkd->bqk", qs, ks,
                        preferred_element_type=f32) + bias_stack
    scores = scores - jnp.max(scores, axis=-1, keepdims=True)
    p = jnp.exp(scores)
    p = p * pl.reciprocal(jnp.sum(p, axis=-1, keepdims=True), approx=True)

    o = jnp.einsum("bqk,bkd->bqd", p.astype(matmul_dtype), vs,
                   preferred_element_type=f32)                   # (H*BT, S, D_K)
    # merge heads back onto lanes and run ONE K=D output projection
    o = jnp.concatenate([o[h * bt:(h + 1) * bt] for h in range(N_HEADS)],
                        axis=-1).reshape(bt * s, d)
    attn = jnp.dot(o.astype(matmul_dtype), wo, preferred_element_type=f32) + bo

    # TODO(synk): dropout is identity (eval mode); no stochastic masking implemented.
    x1 = xf + attn

    # ---------- sublayer 1: x + FeedForward(LayerNorm(x)) ----------
    nx2 = _layernorm(x1, ln2a, ln2b)
    hmid = jnp.maximum(
        jnp.dot(nx2.astype(matmul_dtype), w1, preferred_element_type=f32) + b1, 0.0)
    ff = jnp.dot(hmid.astype(matmul_dtype), w2, preferred_element_type=f32) + b2

    out_ref[...] = (x1 + ff).reshape(bt, s, d).astype(out_ref.dtype)


def _pack_params(params, matmul_dtype):
    """Pack 16 tiny parameter arrays into 4 slabs; fold 1/sqrt(d_k) into wq/bq and
    pre-cast matmul weights to matmul_dtype (fewer DMAs, no per-step weight casts)."""
    f32 = jnp.float32
    scale = 1.0 / math.sqrt(D_K)
    wattn = jnp.concatenate(
        [jnp.asarray(params["wq"], f32) * scale,
         jnp.asarray(params["wk"], f32),
         jnp.asarray(params["wv"], f32),
         jnp.asarray(params["wo"], f32)], axis=1).astype(matmul_dtype)

    def row(*vs):
        v = jnp.concatenate([jnp.asarray(p, f32).reshape(-1) for p in vs])
        return jnp.pad(v, (0, _VEC_LANES - v.shape[0]))

    vecs = jnp.stack([
        row(jnp.asarray(params["bq"], f32) * scale,
            params["bk"], params["bv"]),                 # row 0: fused QKV bias (scaled bq)
        row(params["bo"]),                               # row 1
        row(params["b1"]),                               # row 2
        row(params["b2"]),                               # row 3
        row(params["ln1a"]), row(params["ln1b"]),        # rows 4, 5
        row(params["ln2a"]), row(params["ln2b"]),        # rows 6, 7
    ]).astype(f32)                                       # (8, 128): exactly one vreg tile
    return (wattn,
            jnp.asarray(params["w1"], f32).astype(matmul_dtype),
            jnp.asarray(params["w2"], f32).astype(matmul_dtype),
            vecs)


def encoder_layer(x, mask, params, *, block_b=None, matmul_dtype=jnp.float32):
    B, S, D = x.shape
    assert D == D_MODEL
    if block_b is None:
        # Single grid step by default: v5e/v6e have one TensorCore (splitting is a serial
        # loop that only adds per-step overhead and halves the matmul M dim).  Only split
        # 2-way for v7x's two TensorCores when each half carries enough work (>= ~1024
        # token rows per step) to amortize the per-step launch overhead.
        if B % 2 == 0 and (B // 2) * S >= 1024:
            block_b = B // 2
        else:
            block_b = B
    assert B % block_b == 0
    grid_b = B // block_b

    wattn, w1, w2, vecs = _pack_params(params, matmul_dtype)
    # mask handling hoisted out of the kernel: additive key-mask bias (B, S)
    mask_bias = jnp.where(mask == 0, -1e9, 0.0).astype(jnp.float32).reshape(B, S)

    def full_spec(shape):
        nd = len(shape)
        return pl.BlockSpec(shape, lambda b, nd=nd: (0,) * nd)

    grid_spec = pl.GridSpec(
        grid=(grid_b,),
        in_specs=[
            pl.BlockSpec((block_b, S, D), lambda b: (b, 0, 0)),   # x
            pl.BlockSpec((block_b, S), lambda b: (b, 0)),         # mask bias
            full_spec(wattn.shape),                               # [wq*scale|wk|wv|wo]
            full_spec(w1.shape),
            full_spec(w2.shape),
            full_spec(vecs.shape),                                # biases + LN params
        ],
        out_specs=pl.BlockSpec((block_b, S, D), lambda b: (b, 0, 0)),
    )

    # advisory cost hint so XLA schedules this tiny custom call sensibly
    flops = 2 * B * S * (4 * D * D + 2 * S * D + D * D + 2 * D * D_FF)
    transcendentals = B * S * (N_HEADS * S + 8)
    bytes_accessed = (4 * (2 * B * S * D + B * S)
                      + wattn.size * wattn.dtype.itemsize
                      + w1.size * w1.dtype.itemsize
                      + w2.size * w2.dtype.itemsize
                      + vecs.size * 4)

    kernel = functools.partial(encoder_layer_kernel, matmul_dtype=matmul_dtype)
    return pl.pallas_call(
        kernel,
        out_shape=jax.ShapeDtypeStruct((B, S, D), x.dtype),
        grid_spec=grid_spec,
        compiler_params=pltpu.CompilerParams(dimension_semantics=("parallel",)),
        cost_estimate=pl.CostEstimate(flops=flops,
                                      transcendentals=transcendentals,
                                      bytes_accessed=bytes_accessed),
    )(x, mask_bias, wattn, w1, w2, vecs)


def init_params(key):
    ks = jax.random.split(key, 6)
    f32 = jnp.float32
    return {
        "wq": 0.02 * jax.random.normal(ks[0], (D_MODEL, D_MODEL), f32),
        "wk": 0.02 * jax.random.normal(ks[1], (D_MODEL, D_MODEL), f32),
        "wv": 0.02 * jax.random.normal(ks[2], (D_MODEL, D_MODEL), f32),
        "wo": 0.02 * jax.random.normal(ks[3], (D_MODEL, D_MODEL), f32),
        "w1": 0.02 * jax.random.normal(ks[4], (D_MODEL, D_FF), f32),
        "w2": 0.02 * jax.random.normal(ks[5], (D_FF, D_MODEL), f32),
        "bq": jnp.zeros((1, D_MODEL), f32),
        "bk": jnp.zeros((1, D_MODEL), f32),
        "bv": jnp.zeros((1, D_MODEL), f32),
        "bo": jnp.zeros((1, D_MODEL), f32),
        "b1": jnp.zeros((1, D_FF), f32),
        "b2": jnp.zeros((1, D_MODEL), f32),
        "ln1a": jnp.ones((1, D_MODEL), f32),
        "ln1b": jnp.zeros((1, D_MODEL), f32),
        "ln2a": jnp.ones((1, D_MODEL), f32),
        "ln2b": jnp.zeros((1, D_MODEL), f32),
    }


def _reference(x, mask, p):
    """Pure-JAX reference mirroring the PyTorch forward, for a sanity check."""
    def ln(z, a, b):
        d = z.shape[-1]
        m = jnp.mean(z, -1, keepdims=True)
        s = jnp.sqrt(jnp.sum((z - m) ** 2, -1, keepdims=True) / (d - 1))
        return a * (z - m) / (s + EPS) + b

    nx = ln(x, p["ln1a"], p["ln1b"])
    q = nx @ p["wq"] + p["bq"]
    k = nx @ p["wk"] + p["bk"]
    v = nx @ p["wv"] + p["bv"]
    B, S, _ = x.shape
    qh = q.reshape(B, S, N_HEADS, D_K).transpose(0, 2, 1, 3)
    kh = k.reshape(B, S, N_HEADS, D_K).transpose(0, 2, 1, 3)
    vh = v.reshape(B, S, N_HEADS, D_K).transpose(0, 2, 1, 3)
    sc = jnp.einsum("bhqd,bhkd->bhqk", qh, kh) / jnp.sqrt(D_K)
    sc = jnp.where(mask[:, None, :, :] == 0, -1e9, sc)
    pr = jax.nn.softmax(sc, axis=-1)
    a = jnp.einsum("bhqk,bhkd->bhqd", pr, vh).transpose(0, 2, 1, 3).reshape(B, S, D_MODEL)
    x1 = x + (a @ p["wo"] + p["bo"])
    nx2 = ln(x1, p["ln2a"], p["ln2b"])
    ff = jnp.maximum(nx2 @ p["w1"] + p["b1"], 0.0) @ p["w2"] + p["b2"]
    return x1 + ff


if __name__ == "__main__":
    key = jax.random.PRNGKey(0)
    kx, kp = jax.random.split(key)

    B, S = 4, 8
    x = jax.random.normal(kx, (B, S, D_MODEL), jnp.float32)
    params = init_params(kp)

    # full-visibility mask plus a padded-keys mask to exercise the masking path
    mask_full = jnp.ones((B, 1, S), jnp.float32)
    mask_pad = mask_full.at[:, :, S - 2:].set(0.0)

    for mask in (mask_full, mask_pad):
        out = jax.block_until_ready(encoder_layer(x, mask, params))
        ref = _reference(x, mask, params)
        assert out.shape == (B, S, D_MODEL)
        assert jnp.allclose(out, ref, atol=1e-3, rtol=1e-3), "mismatch vs JAX reference"

    # validate the bf16 MXU-operand path (recommended setting on v6e/v7x)
    out_bf16 = jax.block_until_ready(
        encoder_layer(x, mask_pad, params, matmul_dtype=jnp.bfloat16))
    ref = _reference(x, mask_pad, params)
    assert jnp.allclose(out_bf16, ref, atol=2e-2, rtol=2e-2), "bf16 path mismatch"

    print("KERNEL_OK")
</pallas_src>

<mosaic_0001>
module attributes {stable_mosaic.version = 11 : i64} {
  func.func @encoder_layer_kernel(%arg0: i32, %arg1: memref<4x8x32xf32, #tpu.memory_space<vmem>>, %arg2: memref<4x8xf32, #tpu.memory_space<vmem>>, %arg3: memref<32x128xf32, #tpu.memory_space<vmem>>, %arg4: memref<32x64xf32, #tpu.memory_space<vmem>>, %arg5: memref<64x32xf32, #tpu.memory_space<vmem>>, %arg6: memref<8x128xf32, #tpu.memory_space<vmem>>, %arg7: memref<4x8x32xf32, #tpu.memory_space<vmem>>) attributes {dimension_semantics = [#tpu.dimension_semantics<parallel>], iteration_bounds = array<i64: 1>, scalar_prefetch = 0 : i64, scratch_operands = 0 : i64, tpu.core_type = #tpu.core_type<tc>, window_params = [{transform_indices = @transform_0, window_bounds = array<i64: 4, 8, 32>}, {transform_indices = @transform_1, window_bounds = array<i64: 4, 8>}, {pipeline_mode = #tpu.pipeline_mode<synchronous>, transform_indices = @transform_2, window_bounds = array<i64: 32, 128>}, {pipeline_mode = #tpu.pipeline_mode<synchronous>, transform_indices = @transform_3, window_bounds = array<i64: 32, 64>}, {pipeline_mode = #tpu.pipeline_mode<synchronous>, transform_indices = @transform_4, window_bounds = array<i64: 64, 32>}, {pipeline_mode = #tpu.pipeline_mode<synchronous>, transform_indices = @transform_5, window_bounds = array<i64: 8, 128>}, {transform_indices = @transform_6, window_bounds = array<i64: 4, 8, 32>}]} {
    %c0 = arith.constant 0 : index
    %c0_0 = arith.constant 0 : index
    %c0_1 = arith.constant 0 : index
    %0 = vector.load %arg1[%c0, %c0_0, %c0_1] : memref<4x8x32xf32, #tpu.memory_space<vmem>>, vector<4x8x32xf32>
    %1 = vector.shape_cast %0 : vector<4x8x32xf32> to vector<32x32xf32>
    %c0_2 = arith.constant 0 : index
    %c0_3 = arith.constant 0 : index
    %2 = vector.load %arg3[%c0_2, %c0_3] : memref<32x128xf32, #tpu.memory_space<vmem>>, vector<32x128xf32>
    %3 = vector.extract_strided_slice %2 {offsets = [0, 96], sizes = [32, 32], strides = [1, 1]} : vector<32x128xf32> to vector<32x32xf32>
    %c0_4 = arith.constant 0 : index
    %c0_5 = arith.constant 0 : index
    %4 = vector.load %arg4[%c0_4, %c0_5] : memref<32x64xf32, #tpu.memory_space<vmem>>, vector<32x64xf32>
    %c0_6 = arith.constant 0 : index
    %c0_7 = arith.constant 0 : index
    %5 = vector.load %arg5[%c0_6, %c0_7] : memref<64x32xf32, #tpu.memory_space<vmem>>, vector<64x32xf32>
    %c0_8 = arith.constant 0 : index
    %c0_9 = arith.constant 0 : index
    %6 = vector.load %arg6[%c0_8, %c0_9] : memref<8x128xf32, #tpu.memory_space<vmem>>, vector<8x128xf32>
    %7 = vector.extract_strided_slice %6 {offsets = [0, 0], sizes = [1, 128], strides = [1, 1]} : vector<8x128xf32> to vector<1x128xf32>
    %8 = vector.extract_strided_slice %6 {offsets = [1, 0], sizes = [1, 32], strides = [1, 1]} : vector<8x128xf32> to vector<1x32xf32>
    %9 = vector.extract_strided_slice %6 {offsets = [2, 0], sizes = [1, 64], strides = [1, 1]} : vector<8x128xf32> to vector<1x64xf32>
    %10 = vector.extract_strided_slice %6 {offsets = [3, 0], sizes = [1, 32], strides = [1, 1]} : vector<8x128xf32> to vector<1x32xf32>
    %11 = vector.extract_strided_slice %6 {offsets = [4, 0], sizes = [1, 32], strides = [1, 1]} : vector<8x128xf32> to vector<1x32xf32>
    %12 = vector.extract_strided_slice %6 {offsets = [5, 0], sizes = [1, 32], strides = [1, 1]} : vector<8x128xf32> to vector<1x32xf32>
    %13 = vector.extract_strided_slice %6 {offsets = [6, 0], sizes = [1, 32], strides = [1, 1]} : vector<8x128xf32> to vector<1x32xf32>
    %14 = vector.extract_strided_slice %6 {offsets = [7, 0], sizes = [1, 32], strides = [1, 1]} : vector<8x128xf32> to vector<1x32xf32>
    %c0_10 = arith.constant 0 : index
    %c0_11 = arith.constant 0 : index
    %15 = vector.load %arg2[%c0_10, %c0_11] : memref<4x8xf32, #tpu.memory_space<vmem>>, vector<4x8xf32>
    %16 = vector.shape_cast %15 : vector<4x8xf32> to vector<4x1x8xf32>
    %17 = vector.shape_cast %16 : vector<4x1x8xf32> to vector<4x1x8xf32>
    %18 = vector.broadcast %17 : vector<4x1x8xf32> to vector<4x8x8xf32>
    %19 = tpu.concatenate %18, %18, %18, %18 in 0 : vector<4x8x8xf32>, vector<4x8x8xf32>, vector<4x8x8xf32>, vector<4x8x8xf32> -> vector<16x8x8xf32>
    %cst = arith.constant dense<0.000000e+00> : vector<32xf32>
    %20 = vector.multi_reduction <add>, %1, %cst [1] : vector<32x32xf32> to vector<32xf32>
    %21 = vector.shape_cast %20 : vector<32xf32> to vector<32x1xf32>
    %cst_12 = arith.constant 3.200000e+01 : f32
    %22 = vector.broadcast %cst_12 : f32 to vector<32x1xf32>
    %23 = arith.divf %21, %22 : vector<32x1xf32>
    %24 = vector.broadcast %23 : vector<32x1xf32> to vector<32x32xf32>
    %25 = arith.subf %1, %24 : vector<32x32xf32>
    %26 = arith.mulf %25, %25 : vector<32x32xf32>
    %cst_13 = arith.constant dense<0.000000e+00> : vector<32xf32>
    %27 = vector.multi_reduction <add>, %26, %cst_13 [1] : vector<32x32xf32> to vector<32xf32>
    %28 = vector.shape_cast %27 : vector<32xf32> to vector<32x1xf32>
    %cst_14 = arith.constant 0.0322580636 : f32
    %29 = vector.broadcast %cst_14 : f32 to vector<32x1xf32>
    %30 = arith.mulf %28, %29 : vector<32x1xf32>
    %31 = math.sqrt %30 : vector<32x1xf32>
    %cst_15 = arith.constant 9.99999997E-7 : f32
    %32 = vector.broadcast %cst_15 : f32 to vector<32x1xf32>
    %33 = arith.addf %31, %32 : vector<32x1xf32>
    %34 = tpu.reciprocal %33 {approx = true} : vector<32x1xf32> -> vector<32x1xf32>
    %35 = vector.broadcast %23 : vector<32x1xf32> to vector<32x32xf32>
    %36 = arith.subf %1, %35 : vector<32x32xf32>
    %37 = vector.broadcast %11 : vector<1x32xf32> to vector<32x32xf32>
    %38 = arith.mulf %37, %36 : vector<32x32xf32>
    %39 = vector.broadcast %34 : vector<32x1xf32> to vector<32x32xf32>
    %40 = arith.mulf %38, %39 : vector<32x32xf32>
    %41 = vector.broadcast %12 : vector<1x32xf32> to vector<32x32xf32>
    %42 = arith.addf %40, %41 : vector<32x32xf32>
    %cst_16 = arith.constant dense<0.000000e+00> : vector<32x128xf32>
    %43 = tpu.matmul %42, %2, %cst_16 {dimension_numbers = #tpu.dot_dimension_numbers<[1], [0], [0], [1], [0, 0, 1, 1], [], []>} : vector<32x32xf32>, vector<32x128xf32>, vector<32x128xf32> -> vector<32x128xf32>
    %44 = vector.broadcast %7 : vector<1x128xf32> to vector<32x128xf32>
    %45 = arith.addf %43, %44 : vector<32x128xf32>
    %46 = vector.extract_strided_slice %45 {offsets = [0, 0], sizes = [32, 32], strides = [1, 1]} : vector<32x128xf32> to vector<32x32xf32>
    %47 = vector.shape_cast %46 : vector<32x32xf32> to vector<4x8x32xf32>
    %48 = vector.extract_strided_slice %45 {offsets = [0, 32], sizes = [32, 32], strides = [1, 1]} : vector<32x128xf32> to vector<32x32xf32>
    %49 = vector.shape_cast %48 : vector<32x32xf32> to vector<4x8x32xf32>
    %50 = vector.extract_strided_slice %45 {offsets = [0, 64], sizes = [32, 32], strides = [1, 1]} : vector<32x128xf32> to vector<32x32xf32>
    %51 = vector.shape_cast %50 : vector<32x32xf32> to vector<4x8x32xf32>
    %52 = vector.extract_strided_slice %47 {offsets = [0, 0, 0], sizes = [4, 8, 8], strides = [1, 1, 1]} : vector<4x8x32xf32> to vector<4x8x8xf32>
    %53 = vector.extract_strided_slice %47 {offsets = [0, 0, 8], sizes = [4, 8, 8], strides = [1, 1, 1]} : vector<4x8x32xf32> to vector<4x8x8xf32>
    %54 = vector.extract_strided_slice %47 {offsets = [0, 0, 16], sizes = [4, 8, 8], strides = [1, 1, 1]} : vector<4x8x32xf32> to vector<4x8x8xf32>
    %55 = vector.extract_strided_slice %47 {offsets = [0, 0, 24], sizes = [4, 8, 8], strides = [1, 1, 1]} : vector<4x8x32xf32> to vector<4x8x8xf32>
    %56 = tpu.concatenate %52, %53, %54, %55 in 0 : vector<4x8x8xf32>, vector<4x8x8xf32>, vector<4x8x8xf32>, vector<4x8x8xf32> -> vector<16x8x8xf32>
    %57 = vector.extract_strided_slice %49 {offsets = [0, 0, 0], sizes = [4, 8, 8], strides = [1, 1, 1]} : vector<4x8x32xf32> to vector<4x8x8xf32>
    %58 = vector.extract_strided_slice %49 {offsets = [0, 0, 8], sizes = [4, 8, 8], strides = [1, 1, 1]} : vector<4x8x32xf32> to vector<4x8x8xf32>
    %59 = vector.extract_strided_slice %49 {offsets = [0, 0, 16], sizes = [4, 8, 8], strides = [1, 1, 1]} : vector<4x8x32xf32> to vector<4x8x8xf32>
    %60 = vector.extract_strided_slice %49 {offsets = [0, 0, 24], sizes = [4, 8, 8], strides = [1, 1, 1]} : vector<4x8x32xf32> to vector<4x8x8xf32>
    %61 = tpu.concatenate %57, %58, %59, %60 in 0 : vector<4x8x8xf32>, vector<4x8x8xf32>, vector<4x8x8xf32>, vector<4x8x8xf32> -> vector<16x8x8xf32>
    %62 = vector.extract_strided_slice %51 {offsets = [0, 0, 0], sizes = [4, 8, 8], strides = [1, 1, 1]} : vector<4x8x32xf32> to vector<4x8x8xf32>
    %63 = vector.extract_strided_slice %51 {offsets = [0, 0, 8], sizes = [4, 8, 8], strides = [1, 1, 1]} : vector<4x8x32xf32> to vector<4x8x8xf32>
    %64 = vector.extract_strided_slice %51 {offsets = [0, 0, 16], sizes = [4, 8, 8], strides = [1, 1, 1]} : vector<4x8x32xf32> to vector<4x8x8xf32>
    %65 = vector.extract_strided_slice %51 {offsets = [0, 0, 24], sizes = [4, 8, 8], strides = [1, 1, 1]} : vector<4x8x32xf32> to vector<4x8x8xf32>
    %66 = tpu.concatenate %62, %63, %64, %65 in 0 : vector<4x8x8xf32>, vector<4x8x8xf32>, vector<4x8x8xf32>, vector<4x8x8xf32> -> vector<16x8x8xf32>
    "tpu.trace_start"() <{level = 10 : i32, message = "bqd,bkd->bqk"}> : () -> ()
    %cst_17 = arith.constant dense<0.000000e+00> : vector<16x8x8xf32>
    %67 = tpu.matmul %56, %61, %cst_17 {dimension_numbers = #tpu.dot_dimension_numbers<[2], [2], [1], [1], [0, 0, 0, 1, 1, 1], [0], [0]>} : vector<16x8x8xf32>, vector<16x8x8xf32>, vector<16x8x8xf32> -> vector<16x8x8xf32>
    "tpu.trace_stop"() : () -> ()
    %68 = arith.addf %67, %19 : vector<16x8x8xf32>
    %cst_18 = arith.constant dense<0xFF800000> : vector<16x8xf32>
    %69 = vector.multi_reduction <maximumf>, %68, %cst_18 [2] : vector<16x8x8xf32> to vector<16x8xf32>
    %70 = vector.shape_cast %69 : vector<16x8xf32> to vector<16x8x1xf32>
    %71 = vector.broadcast %70 : vector<16x8x1xf32> to vector<16x8x8xf32>
    %72 = arith.subf %68, %71 : vector<16x8x8xf32>
    %73 = math.exp %72 : vector<16x8x8xf32>
    %cst_19 = arith.constant dense<0.000000e+00> : vector<16x8xf32>
    %74 = vector.multi_reduction <add>, %73, %cst_19 [2] : vector<16x8x8xf32> to vector<16x8xf32>
    %75 = vector.shape_cast %74 : vector<16x8xf32> to vector<16x8x1xf32>
    %76 = tpu.reciprocal %75 {approx = true} : vector<16x8x1xf32> -> vector<16x8x1xf32>
    %77 = vector.broadcast %76 : vector<16x8x1xf32> to vector<16x8x8xf32>
    %78 = arith.mulf %73, %77 : vector<16x8x8xf32>
    "tpu.trace_start"() <{level = 10 : i32, message = "bqk,bkd->bqd"}> : () -> ()
    %cst_20 = arith.constant dense<0.000000e+00> : vector<16x8x8xf32>
    %79 = tpu.matmul %78, %66, %cst_20 {dimension_numbers = #tpu.dot_dimension_numbers<[2], [1], [1], [2], [0, 0, 0, 1, 1, 2], [0], [0]>} : vector<16x8x8xf32>, vector<16x8x8xf32>, vector<16x8x8xf32> -> vector<16x8x8xf32>
    "tpu.trace_stop"() : () -> ()
    %80 = vector.extract_strided_slice %79 {offsets = [0, 0, 0], sizes = [4, 8, 8], strides = [1, 1, 1]} : vector<16x8x8xf32> to vector<4x8x8xf32>
    %81 = vector.extract_strided_slice %79 {offsets = [4, 0, 0], sizes = [4, 8, 8], strides = [1, 1, 1]} : vector<16x8x8xf32> to vector<4x8x8xf32>
    %82 = vector.extract_strided_slice %79 {offsets = [8, 0, 0], sizes = [4, 8, 8], strides = [1, 1, 1]} : vector<16x8x8xf32> to vector<4x8x8xf32>
    %83 = vector.extract_strided_slice %79 {offsets = [12, 0, 0], sizes = [4, 8, 8], strides = [1, 1, 1]} : vector<16x8x8xf32> to vector<4x8x8xf32>
    %84 = tpu.concatenate %80, %81, %82, %83 in 2 : vector<4x8x8xf32>, vector<4x8x8xf32>, vector<4x8x8xf32>, vector<4x8x8xf32> -> vector<4x8x32xf32>
    %85 = vector.shape_cast %84 : vector<4x8x32xf32> to vector<32x32xf32>
    %cst_21 = arith.constant dense<0.000000e+00> : vector<32x32xf32>
    %86 = tpu.matmul %85, %3, %cst_21 {dimension_numbers = #tpu.dot_dimension_numbers<[1], [0], [0], [1], [0, 0, 1, 1], [], []>} : vector<32x32xf32>, vector<32x32xf32>, vector<32x32xf32> -> vector<32x32xf32>
    %87 = vector.broadcast %8 : vector<1x32xf32> to vector<32x32xf32>
    %88 = arith.addf %86, %87 : vector<32x32xf32>
    %89 = arith.addf %1, %88 : vector<32x32xf32>
    %cst_22 = arith.constant dense<0.000000e+00> : vector<32xf32>
    %90 = vector.multi_reduction <add>, %89, %cst_22 [1] : vector<32x32xf32> to vector<32xf32>
    %91 = vector.shape_cast %90 : vector<32xf32> to vector<32x1xf32>
    %cst_23 = arith.constant 3.200000e+01 : f32
    %92 = vector.broadcast %cst_23 : f32 to vector<32x1xf32>
    %93 = arith.divf %91, %92 : vector<32x1xf32>
    %94 = vector.broadcast %93 : vector<32x1xf32> to vector<32x32xf32>
    %95 = arith.subf %89, %94 : vector<32x32xf32>
    %96 = arith.mulf %95, %95 : vector<32x32xf32>
    %cst_24 = arith.constant dense<0.000000e+00> : vector<32xf32>
    %97 = vector.multi_reduction <add>, %96, %cst_24 [1] : vector<32x32xf32> to vector<32xf32>
    %98 = vector.shape_cast %97 : vector<32xf32> to vector<32x1xf32>
    %cst_25 = arith.constant 0.0322580636 : f32
    %99 = vector.broadcast %cst_25 : f32 to vector<32x1xf32>
    %100 = arith.mulf %98, %99 : vector<32x1xf32>
    %101 = math.sqrt %100 : vector<32x1xf32>
    %cst_26 = arith.constant 9.99999997E-7 : f32
    %102 = vector.broadcast %cst_26 : f32 to vector<32x1xf32>
    %103 = arith.addf %101, %102 : vector<32x1xf32>
    %104 = tpu.reciprocal %103 {approx = true} : vector<32x1xf32> -> vector<32x1xf32>
    %105 = vector.broadcast %93 : vector<32x1xf32> to vector<32x32xf32>
    %106 = arith.subf %89, %105 : vector<32x32xf32>
    %107 = vector.broadcast %13 : vector<1x32xf32> to vector<32x32xf32>
    %108 = arith.mulf %107, %106 : vector<32x32xf32>
    %109 = vector.broadcast %104 : vector<32x1xf32> to vector<32x32xf32>
    %110 = arith.mulf %108, %109 : vector<32x32xf32>
    %111 = vector.broadcast %14 : vector<1x32xf32> to vector<32x32xf32>
    %112 = arith.addf %110, %111 : vector<32x32xf32>
    %cst_27 = arith.constant dense<0.000000e+00> : vector<32x64xf32>
    %113 = tpu.matmul %112, %4, %cst_27 {dimension_numbers = #tpu.dot_dimension_numbers<[1], [0], [0], [1], [0, 0, 1, 1], [], []>} : vector<32x32xf32>, vector<32x64xf32>, vector<32x64xf32> -> vector<32x64xf32>
    %114 = vector.broadcast %9 : vector<1x64xf32> to vector<32x64xf32>
    %115 = arith.addf %113, %114 : vector<32x64xf32>
    %cst_28 = arith.constant 0.000000e+00 : f32
    %116 = vector.broadcast %cst_28 : f32 to vector<32x64xf32>
    %117 = arith.maximumf %115, %116 : vector<32x64xf32>
    %cst_29 = arith.constant dense<0.000000e+00> : vector<32x32xf32>
    %118 = tpu.matmul %117, %5, %cst_29 {dimension_numbers = #tpu.dot_dimension_numbers<[1], [0], [0], [1], [0, 0, 1, 1], [], []>} : vector<32x64xf32>, vector<64x32xf32>, vector<32x32xf32> -> vector<32x32xf32>
    %119 = vector.broadcast %10 : vector<1x32xf32> to vector<32x32xf32>
    %120 = arith.addf %118, %119 : vector<32x32xf32>
    %121 = arith.addf %89, %120 : vector<32x32xf32>
    %122 = vector.shape_cast %121 : vector<32x32xf32> to vector<4x8x32xf32>
    %c0_30 = arith.constant 0 : index
    %c0_31 = arith.constant 0 : index
    %c0_32 = arith.constant 0 : index
    %123 = vector.load %arg7[%c0_30, %c0_31, %c0_32] : memref<4x8x32xf32, #tpu.memory_space<vmem>>, vector<4x8x32xf32>
    tpu.vector_store %arg7[%c0_30, %c0_31, %c0_32], %122 {strides = array<i32>} : memref<4x8x32xf32, #tpu.memory_space<vmem>>, vector<4x8x32xf32>,
    return
  }
  func.func @transform_0(%arg0: i32) -> (i32, i32, i32) {
    %c0_i32 = arith.constant 0 : i32
    %c0_i32_0 = arith.constant 0 : i32
    %c0_i32_1 = arith.constant 0 : i32
    return %arg0, %c0_i32, %c0_i32_0 : i32, i32, i32
  }
  func.func @transform_1(%arg0: i32) -> (i32, i32) {
    %c0_i32 = arith.constant 0 : i32
    %c0_i32_0 = arith.constant 0 : i32
    return %arg0, %c0_i32 : i32, i32
  }
  func.func @transform_2(%arg0: i32) -> (i32, i32) {
    %c0_i32 = arith.constant 0 : i32
    %c0_i32_0 = arith.constant 0 : i32
    %c0_i32_1 = arith.constant 0 : i32
    return %c0_i32, %c0_i32_0 : i32, i32
  }
  func.func @transform_3(%arg0: i32) -> (i32, i32) {
    %c0_i32 = arith.constant 0 : i32
    %c0_i32_0 = arith.constant 0 : i32
    %c0_i32_1 = arith.constant 0 : i32
    return %c0_i32, %c0_i32_0 : i32, i32
  }
  func.func @transform_4(%arg0: i32) -> (i32, i32) {
    %c0_i32 = arith.constant 0 : i32
    %c0_i32_0 = arith.constant 0 : i32
    %c0_i32_1 = arith.constant 0 : i32
    return %c0_i32, %c0_i32_0 : i32, i32
  }
  func.func @transform_5(%arg0: i32) -> (i32, i32) {
    %c0_i32 = arith.constant 0 : i32
    %c0_i32_0 = arith.constant 0 : i32
    %c0_i32_1 = arith.constant 0 : i32
    return %c0_i32, %c0_i32_0 : i32, i32
  }
  func.func @transform_6(%arg0: i32) -> (i32, i32, i32) {
    %c0_i32 = arith.constant 0 : i32
    %c0_i32_0 = arith.constant 0 : i32
    %c0_i32_1 = arith.constant 0 : i32
    return %arg0, %c0_i32, %c0_i32_0 : i32, i32, i32
  }
}

</mosaic_0001>

<bundles_post_ra>
// kernel: tpu_custom_call.1
= control target key start
LH: loop header
LB: loop body
LE: loop exit
PB: predicated region body
PF: predicated region fallthrough
CT: control target
= control target key end

     0   :  { %11 = vsyncpa [#allocation3], 0  ;;  %s4755_s0 = inlined_call_operand.vmem [shape: f32[4,8,32], index: 0, kind: input, shape index: {}]   ;;  %s4756_s1 = inlined_call_operand.hbm [shape: f32[4,8], index: 1, kind: input, shape index: {}]   ;;  %s4757_s2 = inlined_call_operand.vmem [shape: f32[32,128], index: 2, kind: input, shape index: {}]   ;;  %s4758_s3 = inlined_call_operand.vmem [shape: f32[32,64], index: 3, kind: input, shape index: {}]   ;;  %s4759_s4 = inlined_call_operand.vmem [shape: f32[64,32], index: 4, kind: input, shape index: {}]   ;;  %s4760_s5 = inlined_call_operand.vmem [shape: f32[8,128], index: 5, kind: input, shape index: {}]   ;;  %s4761_s6 = inlined_call_operand.hbm [shape: f32[4,8,32], index: 6, kind: output, shape index: {}]  }
   0x1   :  { %12 = vsyncpa [#allocation4], 0  ;;  %s3999_s21 = smov [#allocation2]  }
   0x2   :  { %s21_s22 = sshll.u32 %s3999_s21, 4  ;;  %s22_s22 = int_to_ptr.vmem [resolvable:$true] %s21_s22 }
   0x3   :  { %s3963_s23 = scalar_lea.vmem %s22_s22, 64  ;;  %p3968_p1 = scmp.lt.s32.totalorder %s22_s22, %s22_s22 }
   0x4   :  { %p3964_p0 = scmp.ne.s32.totalorder %s22_s22, %s3963_s23  ;;  %p3969_p2 = scmp.lt.s32.totalorder %s3963_s23, %s3963_s23 }
   0x6   :  { %p3970_p3 = por %p3969_p2, %p3968_p1 }
   0x8   :  { %p3971_p4 = pnand %p3970_p3, %p3964_p0 }
   0xa   :  { %3974 = shalt.err (!%p3971_p4)
}
   0xb   :  { %24 = dma.hbm_to_vmem [thread:$0]  %s4756_s1, 64, %s22_s22, [#allocation3]  }
   0xc   :  { %3995 = dma.done.wait [#allocation3], 64  }
   0xd   :  { %3996 = vsyncadd [#allocation3], 4294967232  ;;  %vm103_vm0 = vcmask 261120   ;;  %v36_v0 = vld [vmem:[%s4755_s0] sm:$0xff]  ;;  %v38_v1 = vld [vmem:[%s4755_s0 + $0x10] sm:$0xff]  ;;  %v70_v41 = vlaneseq  ;;  %s4000_s18 = smov 120  }
   0xe   :  { %v37_v2 = vld [vmem:[%s4755_s0 + $0x8] sm:$0xff]  ;;  %v104_v3 = vsel %vm103_vm0, %v36_v0, 0.0  ;;  %v110_v4 = vsel %vm103_vm0, %v38_v1, 0.0  ;;  %v39_v5 = vld [vmem:[%s4755_s0 + $0x18] sm:$0xff]  ;;  %v4096_v29 = vld [vmem:[%s4757_s2 + $0x10] sm:$0xff]  ;;  %s4001_s19 = smov 112  }
   0xf   :  { %105 = vadd.xlane.f32.xlu0 %v104_v3  ;;  %111 = vadd.xlane.f32.xlu1 %v110_v4  ;;  %v107_v6 = vsel %vm103_vm0, %v37_v2, 0.0  ;;  %v113_v7 = vsel %vm103_vm0, %v39_v5, 0.0  ;;  %v4091_v28 = vld [vmem:[%s4757_s2 + $0x18] sm:$0xff]  ;;  %v4103_v30 = vld [vmem:[%s4757_s2 + $0x8] sm:$0xff]  ;;  %v4112_v31 = vld [vmem:[%s4757_s2] sm:$0xff]  ;;  %v4116_v48 = vshrl.u32 %v70_v41, 7 }
  0x10   :  { %3615 = vmatprep.subr.mxu0 %v4091_v28  ;;  %vm4003_vm9 = vmmov 0   ;;  %s4004_s20 = smov 104   ;;  %s4005_s21 = smov 96   ;;  %vm332_vm10 = vcmask 64512   ;;  %vm2991_vm11 = vcmask 130048   ;;  %vm2996_vm12 = vcmask 195584  }
  0x11   :  { %3616 = vmatpush3.msra.mxu0 %v4091_v28  ;;  %v183_v63 = vsub.s32 4, %v4116_v48  ;;  %s4006_s22 = smov 64   ;;  %s4008_s23 = smov 32  }
  0x12   :  { %3617 = vmatprep.subr.mxu0 %v4096_v29  ;;  %s4009_s24 = smov 8   ;;  %s4010_s25 = smov 16  }
  0x13   :  { %108 = vadd.xlane.f32.xlu0 %v107_v6  ;;  %114 = vadd.xlane.f32.xlu1 %v113_v7  ;;  %s4011_s26 = smov 24  }
  0x14   :  { %3618 = vmatpush3.msra.mxu0 %v4096_v29 }
  0x15   :  { %3619 = vmatprep.subr.mxu0 %v4103_v30 }
  0x16   :  { %3620 = vmatpush3.msra.mxu0 %v4103_v30 }
  0x17   :  { %3621 = vmatprep.subr.mxu0 %v4112_v31 }
  0x18   :  { %3622 = vmatpush3.msra.mxu0 %v4112_v31 }
  0x98   :  { %v106_v8 = vpop.xlane.xlu0 %105  ;;  %v112_v9 = vpop.xlane.xlu1 %111 }
  0x99   :  { %v117_v10 = vmul.f32 0.03125, %v106_v8  ;;  %v119_v11 = vmul.f32 0.03125, %v112_v9 }
  0x9b   :  { %v4068_v12 = vsub.f32 %v36_v0, %v117_v10  ;;  %v4070_v13 = vsub.f32 %v38_v1, %v119_v11  ;;  %v56_v1 = vld [vmem:[%s4760_s5] sm:$0xff] }
  0x9c   :  { %v109_v14 = vpop.xlane.xlu0 %108  ;;  %v115_v15 = vpop.xlane.xlu1 %114  ;;  %v184_v4 = vrot.slane %v56_v1, %v183_v63 }
  0x9d   :  { %v118_v16 = vmul.f32 0.03125, %v109_v14  ;;  %v120_v17 = vmul.f32 0.03125, %v115_v15  ;;  %v125_v18 = vmul.f32 %v4068_v12, %v4068_v12  ;;  %v127_v19 = vmul.f32 %v4070_v13, %v4070_v13 }
  0x9e   :  { %v185_v6 = vmul.f32 %v184_v4, %v4068_v12  ;;  %v187_v15 = vmul.f32 %v184_v4, %v4070_v13  ;;  %v4132_v13 = vsub.s32 0, %v4116_v48 }
  0x9f   :  { %v4076_v20 = vsub.f32 %v37_v2, %v118_v16  ;;  %v4078_v21 = vsub.f32 %v39_v5, %v120_v17  ;;  %v129_v22 = vsel %vm103_vm0, %v125_v18, 0.0  ;;  %v135_v23 = vsel %vm103_vm0, %v127_v19, 0.0 }
  0xa0   :  { %130 = vadd.xlane.f32.xlu0 %v129_v22  ;;  %v195_v5 = vsub.s32 5, %v4116_v48 }
  0xa1   :  { %v126_v24 = vmul.f32 %v4076_v20, %v4076_v20  ;;  %v128_v25 = vmul.f32 %v4078_v21, %v4078_v21  ;;  %v186_v10 = vmul.f32 %v184_v4, %v4076_v20  ;;  %v188_v19 = vmul.f32 %v184_v4, %v4078_v21 }
  0xa2   :  { %v196_v7 = vrot.slane %v56_v1, %v195_v5  ;;  %v4007_v4 = vmov 1966171168  }
  0xa3   :  { %v132_v26 = vsel %vm103_vm0, %v126_v24, 0.0  ;;  %v138_v27 = vsel %vm103_vm0, %v128_v25, 0.0  ;;  %v204_v25 = vrot.slane %v56_v1, %v4132_v13  ;;  %v68_v5 = vunpack.c.l.s4 %v4007_v4 }
  0xa4   :  { %136 = vadd.xlane.f32.xlu0 %v135_v23  ;;  %133 = vadd.xlane.f32.xlu1 %v132_v26 }
  0xa8   :  { %139 = vadd.xlane.f32.xlu1 %v138_v27 }
 0x129   :  { %v131_v32 = vpop.xlane.xlu0 %130 }
 0x12a   :  { %v141_v33 = vmul.f32 0.032258064, %v131_v32 }
 0x12c   :  { %3854 = vrsqrt.f32 %v141_v33  ;;  %vm147_vm1 = vcmp.eq.f32.partialorder %v141_v33, inf  ;;  %v150_v43 = vand.u32 2147483648, %v141_v33  ;;  %vm149_vm2 = vcmp.eq.f32.partialorder %v141_v33, 0.0 }
 0x12d   :  { %v134_v34 = vpop.xlane.xlu1 %133  ;;  %v137_v35 = vpop.xlane.xlu0 %136 }
 0x12e   :  { %v142_v36 = vmul.f32 0.032258064, %v134_v34  ;;  %v143_v37 = vmul.f32 0.032258064, %v137_v35 }
 0x130   :  { %3856 = vrsqrt.f32 %v142_v36  ;;  %vm154_vm3 = vcmp.eq.f32.partialorder %v142_v36, inf  ;;  %vm156_vm4 = vcmp.eq.f32.partialorder %v142_v36, 0.0  ;;  %v157_v51 = vand.u32 2147483648, %v142_v36 }
 0x131   :  { %3858 = vrsqrt.f32 %v143_v37  ;;  %v140_v38 = vpop.xlane.xlu1 %139  ;;  %vm161_vm5 = vcmp.eq.f32.partialorder %v143_v37, inf  ;;  %v164_v54 = vand.u32 2147483648, %v143_v37  ;;  %vm163_vm6 = vcmp.eq.f32.partialorder %v143_v37, 0.0 }
 0x132   :  { %v144_v39 = vmul.f32 0.032258064, %v140_v38 }
 0x134   :  { %3860 = vrsqrt.f32 %v144_v39  ;;  %vm168_vm7 = vcmp.eq.f32.partialorder %v144_v39, inf  ;;  %v171_v62 = vand.u32 2147483648, %v144_v39  ;;  %vm170_vm8 = vcmp.eq.f32.partialorder %v144_v39, 0.0 }
 0x139   :  { %v3855_v40 = vpop.eup %3854 }
 0x13a   :  { %v146_v42 = vmul.f32 %v3855_v40, %v141_v33 }
 0x13c   :  { %v148_v44 = vsel %vm147_vm1, %v141_v33, %v146_v42 }
 0x13d   :  { %v3857_v45 = vpop.eup %3856  ;;  %v151_v46 = vsel %vm149_vm2, %v150_v43, %v148_v44 }
 0x13e   :  { %v3859_v47 = vpop.eup %3858  ;;  %v153_v49 = vmul.f32 %v3857_v45, %v142_v36  ;;  %v173_v50 = vadd.f32 1e-06, %v151_v46 }
 0x13f   :  { %v160_v52 = vmul.f32 %v3859_v47, %v143_v37 }
 0x140   :  { %v155_v53 = vsel %vm154_vm3, %v142_v36, %v153_v49  ;;  %3862 = vrcp.f32 %v173_v50  ;;  %v4002_v36 = vmov 0.0  }
 0x141   :  { %v3861_v55 = vpop.eup %3860  ;;  %v158_v56 = vsel %vm156_vm4, %v157_v51, %v155_v53  ;;  %v162_v57 = vsel %vm161_vm5, %v143_v37, %v160_v52  ;;  %3629 = vmatprep.subr.mxu0 %v4002_v36  ;;  %3634 = vmatprep.subr.mxu1 %v4002_v36 }
 0x142   :  { %v174_v58 = vadd.f32 1e-06, %v158_v56  ;;  %v165_v59 = vsel %vm163_vm6, %v164_v54, %v162_v57  ;;  %v167_v60 = vmul.f32 %v3861_v55, %v144_v39  ;;  %3636 = vmatprep.mubr.msk.f32.mxu1 %vm4003_vm9, %v4002_v36  ;;  %vm3327_vm6 = vcmask 523264  }
 0x143   :  { %v175_v61 = vadd.f32 1e-06, %v165_v59 }
 0x144   :  { %3864 = vrcp.f32 %v174_v58  ;;  %v169_v0 = vsel %vm168_vm7, %v144_v39, %v167_v60 }
 0x145   :  { %3866 = vrcp.f32 %v175_v61  ;;  %v172_v2 = vsel %vm170_vm8, %v171_v62, %v169_v0 }
 0x146   :  { %v176_v3 = vadd.f32 1e-06, %v172_v2 }
 0x148   :  { %3868 = vrcp.f32 %v176_v3 }
 0x14d   :  { %v3863_v8 = vpop.eup %3862 }
 0x14e   :  { %v189_v9 = vmul.f32 %v3863_v8, %v185_v6  ;;  %v69_v6 = vunpack.c.0.s8 %v68_v5  ;;  %v3450_v8 = vld.sshfl [vmem:[#allocation2] sm:$0x33 pattern:$0x75316420] }
 0x150   :  { %v197_v11 = vadd.f32 %v196_v7, %v189_v9 }
 0x151   :  { %v3865_v14 = vpop.eup %3864 }
 0x152   :  { %v3867_v16 = vpop.eup %3866  ;;  %3623 = vmatprep.mubr.msk.f32.mxu0 %vm103_vm0, %v197_v11  ;;  %v190_v17 = vmul.f32 %v3865_v14, %v186_v10  ;;  %v66_v10 = vcombine.high %v3450_v8, %v3450_v8 }
 0x153   :  { %v191_v18 = vmul.f32 %v3867_v16, %v187_v15 }
 0x154   :  { %v198_v22 = vadd.f32 %v196_v7, %v190_v17 }
 0x155   :  { %v3869_v23 = vpop.eup %3868  ;;  %v199_v24 = vadd.f32 %v196_v7, %v191_v18 }
 0x156   :  { %3624 = vmatmul.mubr.msk.f32.vlgmr.msra.gmra.mxu0 %vm103_vm0, %v198_v22  ;;  %v192_v12 = vmul.f32 %v3869_v23, %v188_v19 }
 0x157   :  { %3626 = vmatprep.mubr.msk.f32.mxu0 %vm103_vm0, %v199_v24 }
 0x158   :  { %v200_v20 = vadd.f32 %v196_v7, %v192_v12  ;;  %v72_v7 = vsub.s32 %v69_v6, %v4116_v48 }
 0x15a   :  { %3627 = vmatmul.mubr.msk.f32.gmra.mxu0 %vm103_vm0, %v200_v20  ;;  %v73_v9 = vrot.slane %v3450_v8, %v72_v7  ;;  %v80_v15 = vrot.slane %v66_v10, %v72_v7 }
 0x15b   :  { %3631 = vmatprep.mubr.msk.f32.mxu0 %vm4003_vm9, %v4002_v36 }
 0x15c   :  { %v4310_v11 = vrot.slane %v73_v9, %v4132_v13  ;;  %v4318_v19 = vrot.slane %v80_v15, %v4132_v13  ;;  %v81_v22 = vcombine.high %v73_v9, %v73_v9  ;;  %v82_v23 = vcombine.high %v80_v15, %v80_v15 }
 0x15e   :  { %v4324_v20 = vrot.slane %v81_v22, %v4132_v13 }
 0x216   :  { %v3625_v26 = vpop.f32.mrf.mxu0 }
 0x217   :  { %v4135_v27 = vadd.f32 %v3625_v26, %v204_v25 }
 0x218   :  { %v283_v21 = vpop.f32.mrf.mxu0 }
 0x219   :  { %v284_v32 = vadd.f32 %v283_v21, %v204_v25  ;;  %308 = vrot.lane.b32.xlu1 %v4135_v27, %s4000_s18  ;;  %v4329_v21 = vrot.slane %v82_v23, %v4132_v13 }
 0x21a   :  { %v3628_v33 = vpop.f32.mrf.mxu0 }
 0x21b   :  { %306 = vrot.lane.b32.xlu0 %v284_v32, %s4000_s18  ;;  %v4143_v37 = vadd.f32 %v3628_v33, %v204_v25 }
 0x21c   :  { %v293_v34 = vpop.f32.mrf.mxu0 }
 0x21d   :  { %v4138_v35 = vadd.f32 %v293_v34, %v204_v25 }
 0x21f   :  { %314 = vrot.lane.b32.xlu0 %v284_v32, %s4001_s19  ;;  %310 = vrot.lane.b32.xlu1 %v4138_v35, %s4000_s18 }
 0x223   :  { %318 = vrot.lane.b32.xlu0 %v4138_v35, %s4001_s19  ;;  %312 = vrot.lane.b32.xlu1 %v4143_v37, %s4000_s18 }
 0x227   :  { %322 = vrot.lane.b32.xlu0 %v284_v32, %s4004_s20  ;;  %316 = vrot.lane.b32.xlu1 %v4135_v27, %s4001_s19 }
 0x22b   :  { %326 = vrot.lane.b32.xlu0 %v4138_v35, %s4004_s20  ;;  %320 = vrot.lane.b32.xlu1 %v4143_v37, %s4001_s19 }
 0x22f   :  { %330 = vrot.lane.b32.xlu0 %v284_v32, %s4005_s21  ;;  %324 = vrot.lane.b32.xlu1 %v4135_v27, %s4004_s20 }
 0x233   :  { %483 = vrot.lane.b32.xlu0 %v4138_v35, %s4005_s21  ;;  %328 = vrot.lane.b32.xlu1 %v4143_v37, %s4004_s20 }
 0x237   :  { %407 = vrot.lane.b32.xlu1 %v4135_v27, %s4005_s21 }
 0x23b   :  { %559 = vrot.lane.b32.xlu1 %v4143_v37, %s4005_s21 }
 0x28b   :  { %v4163_v38 = vpop.permute.xlu1 %308 }
 0x28c   :  { %711 = vrot.lane.b32.xlu1 %v4163_v38, %s4005_s21 }
 0x28d   :  { %v4167_v39 = vpop.permute.xlu0 %306 }
 0x28e   :  { %635 = vrot.lane.b32.xlu0 %v4167_v39, %s4005_s21 }
 0x291   :  { %v4171_v40 = vpop.permute.xlu1 %310  ;;  %v4173_v41 = vpop.permute.xlu0 %314 }
 0x292   :  { %787 = vrot.lane.b32.xlu0 %v4171_v40, %s4005_s21 }
 0x295   :  { %v4177_v42 = vpop.permute.xlu1 %312  ;;  %v4179_v43 = vpop.permute.xlu0 %318 }
 0x296   :  { %863 = vrot.lane.b32.xlu1 %v4177_v42, %s4005_s21  ;;  %939 = vrot.lane.b32.xlu0 %v4173_v41, %s4005_s21 }
 0x299   :  { %v4185_v44 = vpop.permute.xlu1 %316  ;;  %v4187_v45 = vpop.permute.xlu0 %322 }
 0x29a   :  { %1015 = vrot.lane.b32.xlu1 %v4185_v44, %s4005_s21  ;;  %1091 = vrot.lane.b32.xlu0 %v4179_v43, %s4005_s21 }
 0x29d   :  { %v4193_v46 = vpop.permute.xlu1 %320  ;;  %v4195_v47 = vpop.permute.xlu0 %326 }
 0x29e   :  { %1167 = vrot.lane.b32.xlu1 %v4193_v46, %s4005_s21  ;;  %1243 = vrot.lane.b32.xlu0 %v4187_v45, %s4005_s21 }
 0x2a1   :  { %v4201_v49 = vpop.permute.xlu1 %324  ;;  %v331_v50 = vpop.permute.xlu0 %330 }
 0x2a2   :  { %1319 = vrot.lane.b32.xlu1 %v4201_v49, %s4005_s21  ;;  %1395 = vrot.lane.b32.xlu0 %v4195_v47, %s4005_s21 }
 0x2a3   :  { %3630 = vmatpush3.xpose.msk.msra.mxu0 %vm332_vm10, %v331_v50 }
 0x2a4   :  { %3644 = vmatprep.subr.mxu0 %v4002_v36 }
 0x2a5   :  { %v4209_v51 = vpop.permute.xlu1 %328  ;;  %v484_v53 = vpop.permute.xlu0 %483 }
 0x2a6   :  { %3632 = vmatmul.mubr.msk.f32.vlgmr.msra.gmra.mxu0 %vm332_vm10, %v284_v32  ;;  %1471 = vrot.lane.b32.xlu1 %v4209_v51, %s4005_s21 }
 0x2a7   :  { %1723 = vrot.lane.b32.xlu0 %v284_v32, %s4006_s22  ;;  %3646 = vmatprep.mubr.msk.f32.mxu0 %vm4003_vm9, %v4002_v36 }
 0x2a9   :  { %v408_v52 = vpop.permute.xlu1 %407 }
 0x2aa   :  { %3635 = vmatpush3.xpose.msk.msra.mxu1 %vm332_vm10, %v408_v52 }
 0x2ab   :  { %3639 = vmatprep.subr.mxu1 %v4002_v36 }
 0x2ad   :  { %3637 = vmatmul.mubr.msk.f32.vlgmr.msra.gmra.mxu1 %vm332_vm10, %v4135_v27  ;;  %v560_v54 = vpop.permute.xlu1 %559 }
 0x2ae   :  { %3640 = vmatpush3.xpose.msk.msra.mxu1 %vm332_vm10, %v484_v53  ;;  %3645 = vmatpush3.xpose.msk.msra.mxu0 %vm332_vm10, %v560_v54 }
 0x2af   :  { %3641 = vmatprep.mubr.msk.f32.mxu1 %vm4003_vm9, %v4002_v36  ;;  %3654 = vmatprep.subr.mxu0 %v4002_v36 }
 0x2b0   :  { %3649 = vmatprep.subr.mxu1 %v4002_v36 }
 0x2b1   :  { %3642 = vmatmul.mubr.msk.f32.vlgmr.msra.gmra.mxu1 %vm332_vm10, %v4138_v35  ;;  %3647 = vmatmul.mubr.msk.f32.vlgmr.msra.gmra.mxu0 %vm332_vm10, %v4143_v37 }
 0x2b2   :  { %3656 = vmatprep.mubr.msk.f32.mxu0 %vm4003_vm9, %v4002_v36  ;;  %3651 = vmatprep.mubr.msk.f32.mxu1 %vm4003_vm9, %v4002_v36 }
 0x2fe   :  { %v712_v55 = vpop.permute.xlu1 %711 }
 0x2ff   :  { %3655 = vmatpush3.xpose.msk.msra.mxu0 %vm332_vm10, %v712_v55 }
 0x300   :  { %v636_v56 = vpop.permute.xlu0 %635  ;;  %3664 = vmatprep.subr.mxu0 %v4002_v36 }
 0x301   :  { %3650 = vmatpush3.xpose.msk.msra.mxu1 %vm332_vm10, %v636_v56 }
 0x302   :  { %3657 = vmatmul.mubr.msk.f32.vlgmr.msra.gmra.mxu0 %vm332_vm10, %v4163_v38  ;;  %3659 = vmatprep.subr.mxu1 %v4002_v36 }
 0x303   :  { %3666 = vmatprep.mubr.msk.f32.mxu0 %vm4003_vm9, %v4002_v36 }
 0x304   :  { %3652 = vmatmul.mubr.msk.f32.vlgmr.msra.gmra.mxu1 %vm332_vm10, %v4167_v39  ;;  %v788_v57 = vpop.permute.xlu0 %787 }
 0x305   :  { %3660 = vmatpush3.xpose.msk.msra.mxu1 %vm332_vm10, %v788_v57  ;;  %3661 = vmatprep.mubr.msk.f32.mxu1 %vm4003_vm9, %v4002_v36 }
 0x306   :  { %3669 = vmatprep.subr.mxu1 %v4002_v36 }
 0x308   :  { %v864_v58 = vpop.permute.xlu1 %863  ;;  %3662 = vmatmul.mubr.msk.f32.vlgmr.msra.gmra.mxu1 %vm332_vm10, %v4171_v40  ;;  %v940_v59 = vpop.permute.xlu0 %939 }
 0x309   :  { %3665 = vmatpush3.xpose.msk.msra.mxu0 %vm332_vm10, %v864_v58  ;;  %3670 = vmatpush3.xpose.msk.msra.mxu1 %vm332_vm10, %v940_v59 }
 0x30a   :  { %3671 = vmatprep.mubr.msk.f32.mxu1 %vm4003_vm9, %v4002_v36  ;;  %3674 = vmatprep.subr.mxu0 %v4002_v36 }
 0x30b   :  { %3679 = vmatprep.subr.mxu1 %v4002_v36 }
 0x30c   :  { %v1016_v60 = vpop.permute.xlu1 %1015  ;;  %3667 = vmatmul.mubr.msk.f32.vlgmr.msra.gmra.mxu0 %vm332_vm10, %v4177_v42  ;;  %3672 = vmatmul.mubr.msk.f32.vlgmr.msra.gmra.mxu1 %vm332_vm10, %v4173_v41  ;;  %v1092_v61 = vpop.permute.xlu0 %1091 }
 0x30d   :  { %3675 = vmatpush3.xpose.msk.msra.mxu0 %vm332_vm10, %v1016_v60  ;;  %3680 = vmatpush3.xpose.msk.msra.mxu1 %vm332_vm10, %v1092_v61 }
 0x30e   :  { %3676 = vmatprep.mubr.msk.f32.mxu0 %vm4003_vm9, %v4002_v36  ;;  %3681 = vmatprep.mubr.msk.f32.mxu1 %vm4003_vm9, %v4002_v36 }
 0x30f   :  { %3684 = vmatprep.subr.mxu0 %v4002_v36  ;;  %3689 = vmatprep.subr.mxu1 %v4002_v36 }
 0x310   :  { %v1168_v62 = vpop.permute.xlu1 %1167  ;;  %3677 = vmatmul.mubr.msk.f32.vlgmr.msra.gmra.mxu0 %vm332_vm10, %v4185_v44  ;;  %3682 = vmatmul.mubr.msk.f32.vlgmr.msra.gmra.mxu1 %vm332_vm10, %v4179_v43  ;;  %v1244_v63 = vpop.permute.xlu0 %1243 }
 0x311   :  { %3685 = vmatpush3.xpose.msk.msra.mxu0 %vm332_vm10, %v1168_v62  ;;  %3690 = vmatpush3.xpose.msk.msra.mxu1 %vm332_vm10, %v1244_v63 }
 0x312   :  { %3686 = vmatprep.mubr.msk.f32.mxu0 %vm4003_vm9, %v4002_v36  ;;  %3691 = vmatprep.mubr.msk.f32.mxu1 %vm4003_vm9, %v4002_v36 }
 0x313   :  { %3694 = vmatprep.subr.mxu0 %v4002_v36  ;;  %3699 = vmatprep.subr.mxu1 %v4002_v36 }
 0x314   :  { %v1320_v0 = vpop.permute.xlu1 %1319  ;;  %3687 = vmatmul.mubr.msk.f32.vlgmr.msra.gmra.mxu0 %vm332_vm10, %v4193_v46  ;;  %3692 = vmatmul.mubr.msk.f32.vlgmr.msra.gmra.mxu1 %vm332_vm10, %v4187_v45  ;;  %v1396_v1 = vpop.permute.xlu0 %1395 }
 0x315   :  { %3695 = vmatpush3.xpose.msk.msra.mxu0 %vm332_vm10, %v1320_v0  ;;  %3700 = vmatpush3.xpose.msk.msra.mxu1 %vm332_vm10, %v1396_v1 }
 0x316   :  { %3696 = vmatprep.mubr.msk.f32.mxu0 %vm4003_vm9, %v4002_v36  ;;  %3701 = vmatprep.mubr.msk.f32.mxu1 %vm4003_vm9, %v4002_v36 }
 0x317   :  { %3704 = vmatprep.subr.mxu0 %v4002_v36  ;;  %3709 = vmatprep.subr.mxu1 %v4002_v36 }
 0x318   :  { %v1472_v2 = vpop.permute.xlu1 %1471  ;;  %3697 = vmatmul.mubr.msk.f32.vlgmr.msra.gmra.mxu0 %vm332_vm10, %v4201_v49  ;;  %3702 = vmatmul.mubr.msk.f32.vlgmr.msra.gmra.mxu1 %vm332_vm10, %v4195_v47 }
 0x319   :  { %v1724_v3 = vpop.permute.xlu0 %1723  ;;  %3705 = vmatpush3.xpose.msk.msra.mxu0 %vm332_vm10, %v1472_v2  ;;  %3706 = vmatprep.mubr.msk.f32.mxu0 %vm4003_vm9, %v4002_v36 }
 0x31a   :  { %3710 = vmatpush3.msra.mxu1 %v1724_v3  ;;  %3714 = vmatprep.subr.mxu0 %v4002_v36 }
 0x31b   :  { %3711 = vmatprep.mubr.msk.f32.mxu1 %vm4003_vm9, %v4002_v36  ;;  %3719 = vmatprep.subr.mxu1 %v4002_v36 }
 0x31c   :  { %3707 = vmatmul.mubr.msk.f32.vlgmr.msra.gmra.mxu0 %vm332_vm10, %v4209_v51 }
 0x31d   :  { %3716 = vmatprep.mubr.msk.f32.mxu0 %vm4003_vm9, %v4002_v36 }
 0x366   :  { %v403_v14 = vpop.f32.mrf.mxu0 }
 0x367   :  { %v4313_v16 = vadd.f32 %v403_v14, %v4310_v11 }
 0x368   :  { %v3633_v17 = vpop.f32.mrf.mxu0 }
 0x369   :  { %v1547_v18 = vsel %vm332_vm10, %v4313_v16, -inf }
 0x36a   :  { %1548 = vmax.xlane.f32.xlu0 %v1547_v18 }
 0x36d   :  { %v479_v24 = vpop.f32.mrf.mxu1 }
 0x36e   :  { %v4321_v12 = vadd.f32 %v479_v24, %v4318_v19 }
 0x36f   :  { %v3638_v25 = vpop.f32.mrf.mxu1 }
 0x370   :  { %v1550_v26 = vsel %vm332_vm10, %v4321_v12, -inf }
 0x371   :  { %1551 = vmax.xlane.f32.xlu1 %v1550_v26  ;;  %v555_v32 = vpop.f32.mrf.mxu1  ;;  %v631_v33 = vpop.f32.mrf.mxu0 }
 0x372   :  { %v4332_v34 = vadd.f32 %v555_v32, %v4324_v20  ;;  %v4335_v53 = vadd.f32 %v631_v33, %v4329_v21 }
 0x373   :  { %v3643_v50 = vpop.f32.mrf.mxu1  ;;  %v3648_v52 = vpop.f32.mrf.mxu0 }
 0x374   :  { %v1553_v54 = vsel %vm332_vm10, %v4332_v34, -inf  ;;  %v1556_v55 = vsel %vm332_vm10, %v4335_v53, -inf }
 0x375   :  { %1554 = vmax.xlane.f32.xlu0 %v1553_v54 }
 0x379   :  { %1557 = vmax.xlane.f32.xlu0 %v1556_v55 }
 0x3c2   :  { %v783_v13 = vpop.f32.mrf.mxu0 }
 0x3c3   :  { %v4342_v56 = vadd.f32 %v783_v13, %v4318_v19 }
 0x3c4   :  { %v707_v57 = vpop.f32.mrf.mxu1  ;;  %v3658_v58 = vpop.f32.mrf.mxu0 }
 0x3c5   :  { %v4345_v59 = vadd.f32 %v707_v57, %v4310_v11  ;;  %v1562_v60 = vsel %vm332_vm10, %v4342_v56, -inf }
 0x3c6   :  { %1563 = vmax.xlane.f32.xlu1 %v1562_v60  ;;  %v3653_v61 = vpop.f32.mrf.mxu1 }
 0x3c7   :  { %v1559_v62 = vsel %vm332_vm10, %v4345_v59, -inf }
 0x3c8   :  { %1560 = vmax.xlane.f32.xlu0 %v1559_v62  ;;  %v859_v63 = vpop.f32.mrf.mxu1 }
 0x3c9   :  { %v4352_v0 = vadd.f32 %v859_v63, %v4324_v20 }
 0x3ca   :  { %v3663_v1 = vpop.f32.mrf.mxu1 }
 0x3cb   :  { %v1565_v2 = vsel %vm332_vm10, %v4352_v0, -inf }
 0x3cc   :  { %v935_v3 = vpop.f32.mrf.mxu0  ;;  %1566 = vmax.xlane.f32.xlu0 %v1565_v2  ;;  %v1011_v4 = vpop.f32.mrf.mxu1 }
 0x3cd   :  { %v4357_v5 = vadd.f32 %v935_v3, %v4329_v21  ;;  %v4360_v6 = vadd.f32 %v1011_v4, %v4310_v11 }
 0x3ce   :  { %v3668_v7 = vpop.f32.mrf.mxu0  ;;  %v3673_v8 = vpop.f32.mrf.mxu1 }
 0x3cf   :  { %v1568_v9 = vsel %vm332_vm10, %v4357_v5, -inf  ;;  %v1571_v10 = vsel %vm332_vm10, %v4360_v6, -inf }
 0x3d0   :  { %1569 = vmax.xlane.f32.xlu1 %v1568_v9  ;;  %v1087_v14 = vpop.f32.mrf.mxu0  ;;  %1572 = vmax.xlane.f32.xlu0 %v1571_v10  ;;  %v1163_v15 = vpop.f32.mrf.mxu1 }
 0x3d1   :  { %v4367_v17 = vadd.f32 %v1087_v14, %v4318_v19  ;;  %v4370_v18 = vadd.f32 %v1163_v15, %v4324_v20 }
 0x3d2   :  { %v3678_v22 = vpop.f32.mrf.mxu0  ;;  %v3683_v23 = vpop.f32.mrf.mxu1 }
 0x3d3   :  { %v1574_v24 = vsel %vm332_vm10, %v4367_v17, -inf  ;;  %v1577_v25 = vsel %vm332_vm10, %v4370_v18, -inf }
 0x3d4   :  { %1575 = vmax.xlane.f32.xlu1 %v1574_v24  ;;  %v1239_v26 = vpop.f32.mrf.mxu0  ;;  %1578 = vmax.xlane.f32.xlu0 %v1577_v25  ;;  %v1315_v32 = vpop.f32.mrf.mxu1 }
 0x3d5   :  { %v4377_v33 = vadd.f32 %v1239_v26, %v4329_v21  ;;  %v4380_v50 = vadd.f32 %v1315_v32, %v4310_v11 }
 0x3d6   :  { %v3688_v52 = vpop.f32.mrf.mxu0  ;;  %v3693_v54 = vpop.f32.mrf.mxu1 }
 0x3d7   :  { %v1580_v55 = vsel %vm332_vm10, %v4377_v33, -inf  ;;  %v1583_v13 = vsel %vm332_vm10, %v4380_v50, -inf }
 0x3d8   :  { %1581 = vmax.xlane.f32.xlu1 %v1580_v55  ;;  %v1391_v57 = vpop.f32.mrf.mxu0  ;;  %1584 = vmax.xlane.f32.xlu0 %v1583_v13  ;;  %v1467_v58 = vpop.f32.mrf.mxu1 }
 0x3d9   :  { %v4387_v60 = vadd.f32 %v1391_v57, %v4318_v19 }
 0x3da   :  { %v3698_v61 = vpop.f32.mrf.mxu0  ;;  %v3703_v62 = vpop.f32.mrf.mxu1 }
 0x3db   :  { %v1586_v11 = vsel %vm332_vm10, %v4387_v60, -inf }
 0x3dc   :  { %1587 = vmax.xlane.f32.xlu1 %v1586_v11  ;;  %v1543_v63 = vpop.f32.mrf.mxu0 }
 0x3dd   :  { %v4392_v1 = vadd.f32 %v1543_v63, %v4329_v21 }
 0x3de   :  { %v3708_v2 = vpop.f32.mrf.mxu0 }
 0x3df   :  { %v1592_v3 = vsel %vm332_vm10, %v4392_v1, -inf }
 0x3e0   :  { %1593 = vmax.xlane.f32.xlu1 %v1592_v3 }
 0x3ee   :  { %1875 = vrot.lane.b32.xlu0 %v4138_v35, %s4006_s22 }
 0x3f1   :  { %1799 = vrot.lane.b32.xlu1 %v4135_v27, %s4006_s22 }
 0x3f2   :  { %1951 = vrot.lane.b32.xlu0 %v4143_v37, %s4006_s22 }
 0x3f3   :  { %v1549_v19 = vpop.xlane.xlu0 %1548 }
 0x3f6   :  { %2027 = vrot.lane.b32.xlu0 %v4167_v39, %s4006_s22 }
 0x3fa   :  { %v1552_v21 = vpop.xlane.xlu1 %1551  ;;  %2103 = vrot.lane.b32.xlu0 %v4163_v38, %s4006_s22 }
 0x3fb   :  { %v1596_v4 = vsub.f32 %v4321_v12, %v1552_v21 }
 0x3fd   :  { %v1613_v7 = vmul.f32 1.442695, %v1596_v4 }
 0x3fe   :  { %2179 = vrot.lane.b32.xlu0 %v4171_v40, %s4006_s22  ;;  %v1555_v35 = vpop.xlane.xlu0 %1554 }
 0x3ff   :  { %3870 = vpow2.f32 %v1613_v7  ;;  %v1597_v9 = vsub.f32 %v4332_v34, %v1555_v35 }
 0x401   :  { %v1615_v10 = vmul.f32 1.442695, %v1597_v9 }
 0x402   :  { %2255 = vrot.lane.b32.xlu0 %v4177_v42, %s4006_s22  ;;  %v1558_v27 = vpop.xlane.xlu0 %1557 }
 0x403   :  { %v1598_v37 = vsub.f32 %v4335_v53, %v1558_v27  ;;  %v4425_v53 = vadd.f32 %v1467_v58, %v4324_v20 }
 0x405   :  { %v1617_v39 = vmul.f32 1.442695, %v1598_v37 }
 0x406   :  { %2331 = vrot.lane.b32.xlu0 %v4173_v41, %s4006_s22  ;;  %v1589_v41 = vsel %vm332_vm10, %v4425_v53, -inf }
 0x407   :  { %3872 = vpow2.f32 %v1617_v39 }
 0x40a   :  { %2407 = vrot.lane.b32.xlu0 %v4185_v44, %s4006_s22  ;;  %v1595_v44 = vsub.f32 %v4313_v16, %v1549_v19 }
 0x40c   :  { %v4416_v38 = vpop.eup %3870  ;;  %v1611_v8 = vmul.f32 1.442695, %v1595_v44 }
 0x40d   :  { %v1646_v40 = vsel %vm332_vm10, %v4416_v38, 0.0 }
 0x40e   :  { %3874 = vpow2.f32 %v1611_v8 }
 0x40f   :  { %3876 = vpow2.f32 %v1615_v10 }
 0x414   :  { %v4420_v12 = vpop.eup %3872 }
 0x415   :  { %1647 = vadd.xlane.f32.xlu1 %v1646_v40  ;;  %v1652_v42 = vsel %vm332_vm10, %v4420_v12, 0.0 }
 0x419   :  { %1653 = vadd.xlane.f32.xlu1 %v1652_v42 }
 0x41b   :  { %v4436_v34 = vpop.eup %3874 }
 0x41c   :  { %v1643_v57 = vsel %vm332_vm10, %v4436_v34, 0.0  ;;  %v4442_v58 = vpop.eup %3876 }
 0x41d   :  { %v1649_v2 = vsel %vm332_vm10, %v4442_v58, 0.0 }
 0x429   :  { %1590 = vmax.xlane.f32.xlu0 %v1589_v41 }
 0x43f   :  { %2483 = vrot.lane.b32.xlu0 %v4179_v43, %s4006_s22 }
 0x44f   :  { %v1564_v14 = vpop.xlane.xlu1 %1563 }
 0x450   :  { %v1600_v15 = vsub.f32 %v4342_v56, %v1564_v14 }
 0x451   :  { %v1561_v20 = vpop.xlane.xlu0 %1560 }
 0x452   :  { %v1621_v22 = vmul.f32 1.442695, %v1600_v15  ;;  %v1599_v23 = vsub.f32 %v4345_v59, %v1561_v20 }
 0x454   :  { %3878 = vpow2.f32 %v1621_v22  ;;  %v1619_v24 = vmul.f32 1.442695, %v1599_v23 }
 0x455   :  { %v1567_v25 = vpop.xlane.xlu0 %1566 }
 0x456   :  { %3880 = vpow2.f32 %v1619_v24  ;;  %v1601_v43 = vsub.f32 %v4352_v0, %v1567_v25 }
 0x458   :  { %v1623_v16 = vmul.f32 1.442695, %v1601_v43 }
 0x459   :  { %v1570_v26 = vpop.xlane.xlu1 %1569  ;;  %v1573_v32 = vpop.xlane.xlu0 %1572 }
 0x45a   :  { %3882 = vpow2.f32 %v1623_v16  ;;  %v1602_v52 = vsub.f32 %v4357_v5, %v1570_v26  ;;  %v1603_v56 = vsub.f32 %v4360_v6, %v1573_v32 }
 0x45c   :  { %v1625_v54 = vmul.f32 1.442695, %v1602_v52  ;;  %v1627_v55 = vmul.f32 1.442695, %v1603_v56 }
 0x45d   :  { %v1576_v13 = vpop.xlane.xlu1 %1575  ;;  %v1579_v59 = vpop.xlane.xlu0 %1578 }
 0x45e   :  { %3884 = vpow2.f32 %v1625_v54  ;;  %v1604_v0 = vsub.f32 %v4367_v17, %v1576_v13  ;;  %v1605_v61 = vsub.f32 %v4370_v18, %v1579_v59  ;;  %1644 = vadd.xlane.f32.xlu0 %v1643_v57 }
 0x45f   :  { %3886 = vpow2.f32 %v1627_v55 }
 0x460   :  { %v1629_v62 = vmul.f32 1.442695, %v1604_v0  ;;  %v1631_v5 = vmul.f32 1.442695, %v1605_v61 }
 0x461   :  { %v4446_v11 = vpop.eup %3878  ;;  %v1582_v6 = vpop.xlane.xlu1 %1581 }
 0x462   :  { %v1585_v63 = vpop.xlane.xlu0 %1584  ;;  %3888 = vpow2.f32 %v1629_v62  ;;  %v1606_v3 = vsub.f32 %v4377_v33, %v1582_v6  ;;  %1650 = vadd.xlane.f32.xlu0 %v1649_v2  ;;  %v1658_v17 = vsel %vm332_vm10, %v4446_v11, 0.0 }
 0x463   :  { %v1607_v19 = vsub.f32 %v4380_v50, %v1585_v63  ;;  %v4454_v18 = vpop.eup %3880  ;;  %3890 = vpow2.f32 %v1631_v5  ;;  %1659 = vadd.xlane.f32.xlu1 %v1658_v17 }
 0x464   :  { %v1633_v21 = vmul.f32 1.442695, %v1606_v3  ;;  %v1655_v35 = vsel %vm332_vm10, %v4454_v18, 0.0 }
 0x465   :  { %v1635_v4 = vmul.f32 1.442695, %v1607_v19  ;;  %v1588_v7 = vpop.xlane.xlu1 %1587 }
 0x466   :  { %3892 = vpow2.f32 %v1633_v21  ;;  %v1608_v27 = vsub.f32 %v4387_v60, %v1588_v7  ;;  %1656 = vadd.xlane.f32.xlu0 %v1655_v35  ;;  %v1876_v32 = vpop.permute.xlu0 %1875 }
 0x467   :  { %v4459_v33 = vpop.eup %3882  ;;  %3894 = vpow2.f32 %v1635_v4 }
 0x468   :  { %v1637_v50 = vmul.f32 1.442695, %v1608_v27  ;;  %v1661_v37 = vsel %vm332_vm10, %v4459_v33, 0.0 }
 0x469   :  { %v1594_v39 = vpop.xlane.xlu1 %1593 }
 0x46a   :  { %3896 = vpow2.f32 %v1637_v50  ;;  %v1610_v40 = vsub.f32 %v4392_v1, %v1594_v39  ;;  %1662 = vadd.xlane.f32.xlu0 %v1661_v37  ;;  %v1952_v52 = vpop.permute.xlu0 %1951 }
 0x46b   :  { %v4464_v42 = vpop.eup %3884 }
 0x46c   :  { %v4466_v41 = vpop.eup %3886  ;;  %v1641_v44 = vmul.f32 1.442695, %v1610_v40  ;;  %v1664_v60 = vsel %vm332_vm10, %v4464_v42, 0.0 }
 0x46d   :  { %v1800_v8 = vpop.permute.xlu1 %1799  ;;  %1665 = vadd.xlane.f32.xlu1 %v1664_v60  ;;  %v1667_v9 = vsel %vm332_vm10, %v4466_v41, 0.0 }
 0x46e   :  { %3898 = vpow2.f32 %v1641_v44  ;;  %3715 = vmatpush3.msra.mxu0 %v1800_v8  ;;  %1668 = vadd.xlane.f32.xlu0 %v1667_v9  ;;  %v4499_v56 = vpop.permute.xlu0 %2027 }
 0x46f   :  { %v4472_v10 = vpop.eup %3888  ;;  %3724 = vmatprep.subr.mxu0 %v4002_v36 }
 0x470   :  { %v4475_v1 = vpop.eup %3890  ;;  %v1670_v14 = vsel %vm332_vm10, %v4472_v10, 0.0 }
 0x471   :  { %1671 = vadd.xlane.f32.xlu1 %v1670_v14  ;;  %v1673_v15 = vsel %vm332_vm10, %v4475_v1, 0.0 }
 0x472   :  { %1674 = vadd.xlane.f32.xlu0 %v1673_v15  ;;  %v2104_v54 = vpop.permute.xlu0 %2103 }
 0x473   :  { %v4481_v20 = vpop.eup %3892 }
 0x474   :  { %v4483_v22 = vpop.eup %3894  ;;  %v1676_v23 = vsel %vm332_vm10, %v4481_v20, 0.0 }
 0x475   :  { %1677 = vadd.xlane.f32.xlu1 %v1676_v23  ;;  %v1679_v24 = vsel %vm332_vm10, %v4483_v22, 0.0 }
 0x476   :  { %1680 = vadd.xlane.f32.xlu0 %v1679_v24  ;;  %v4507_v55 = vpop.permute.xlu0 %2179 }
 0x477   :  { %v4489_v25 = vpop.eup %3896 }
 0x478   :  { %v1682_v43 = vsel %vm332_vm10, %v4489_v25, 0.0 }
 0x479   :  { %1683 = vadd.xlane.f32.xlu1 %v1682_v43 }
 0x47a   :  { %v4509_v59 = vpop.permute.xlu0 %2255 }
 0x47b   :  { %v4493_v16 = vpop.eup %3898 }
 0x47c   :  { %v1688_v26 = vsel %vm332_vm10, %v4493_v16, 0.0 }
 0x47d   :  { %1689 = vadd.xlane.f32.xlu1 %v1688_v26 }
 0x48c   :  { %2635 = vrot.lane.b32.xlu0 %v4187_v45, %s4006_s22  ;;  %v4511_v45 = vpop.permute.xlu0 %2331 }
 0x490   :  { %2711 = vrot.lane.b32.xlu0 %v4201_v49, %s4006_s22  ;;  %v4514_v61 = vpop.permute.xlu0 %2407 }
 0x494   :  { %2787 = vrot.lane.b32.xlu0 %v4195_v47, %s4006_s22 }
 0x498   :  { %2863 = vrot.lane.b32.xlu0 %v4209_v51, %s4006_s22 }
 0x49c   :  { %3015 = vrot.lane.b32.xlu0 %v4091_v28, %s4008_s23 }
 0x49e   :  { %v1648_v13 = vpop.xlane.xlu1 %1647 }
 0x49f   :  { %3900 = vrcp.f32 %v1648_v13 }
 0x4a0   :  { %3009 = vrot.lane.b32.xlu0 %v4112_v31, %s4008_s23 }
 0x4a2   :  { %v1654_v57 = vpop.xlane.xlu1 %1653 }
 0x4a3   :  { %3902 = vrcp.f32 %v1654_v57 }
 0x4ac   :  { %v3901_v0 = vpop.eup %3900 }
 0x4ad   :  { %v1708_v49 = vmul.f32 %v3901_v0, %v4416_v38 }
 0x4af   :  { %3717 = vmatmul.mubr.msk.f32.vlgmr.msra.gmra.mxu0 %vm332_vm10, %v1708_v49 }
 0x4b0   :  { %v3903_v47 = vpop.eup %3902  ;;  %3725 = vmatpush3.msra.mxu0 %v1952_v52  ;;  %3726 = vmatprep.mubr.msk.f32.mxu0 %vm4003_vm9, %v4002_v36 }
 0x4b1   :  { %3734 = vmatprep.subr.mxu0 %v4002_v36  ;;  %v1710_v51 = vmul.f32 %v3903_v47, %v4420_v12 }
 0x4b2   :  { %v1591_v62 = vpop.xlane.xlu0 %1590 }
 0x4b3   :  { %v1609_v5 = vsub.f32 %v4425_v53, %v1591_v62  ;;  %3727 = vmatmul.mubr.msk.f32.vlgmr.msra.gmra.mxu0 %vm332_vm10, %v1710_v51 }
 0x4b4   :  { %3735 = vmatpush3.msra.mxu0 %v2104_v54  ;;  %3736 = vmatprep.mubr.msk.f32.mxu0 %vm4003_vm9, %v4002_v36 }
 0x4b5   :  { %v1639_v38 = vmul.f32 1.442695, %v1609_v5  ;;  %3744 = vmatprep.subr.mxu0 %v4002_v36 }
 0x4b6   :  { %v4532_v12 = vpop.permute.xlu0 %2483 }
 0x4b7   :  { %3904 = vpow2.f32 %v1639_v38 }
 0x4c4   :  { %v4526_v6 = vpop.eup %3904 }
 0x4c5   :  { %v1685_v63 = vsel %vm332_vm10, %v4526_v6, 0.0 }
 0x4c6   :  { %1686 = vadd.xlane.f32.xlu1 %v1685_v63 }
 0x4d7   :  { %2559 = vrot.lane.b32.xlu1 %v4193_v46, %s4006_s22 }
 0x4db   :  { %3013 = vrot.lane.b32.xlu1 %v4096_v29, %s4008_s23 }
 0x4df   :  { %3011 = vrot.lane.b32.xlu1 %v4103_v30, %s4008_s23 }
 0x4e7   :  { %v1645_v53 = vpop.xlane.xlu0 %1644 }
 0x4e8   :  { %3906 = vrcp.f32 %v1645_v53 }
 0x4eb   :  { %v1651_v2 = vpop.xlane.xlu0 %1650 }
 0x4ec   :  { %3908 = vrcp.f32 %v1651_v2  ;;  %v1660_v3 = vpop.xlane.xlu1 %1659 }
 0x4ed   :  { %3910 = vrcp.f32 %v1660_v3 }
 0x4ef   :  { %v1657_v19 = vpop.xlane.xlu0 %1656 }
 0x4f0   :  { %3912 = vrcp.f32 %v1657_v19 }
 0x4f3   :  { %v1663_v17 = vpop.xlane.xlu0 %1662 }
 0x4f4   :  { %3914 = vrcp.f32 %v1663_v17 }
 0x4f5   :  { %v3907_v21 = vpop.eup %3906 }
 0x4f6   :  { %v1666_v4 = vpop.xlane.xlu1 %1665  ;;  %v1707_v35 = vmul.f32 %v3907_v21, %v4436_v34 }
 0x4f7   :  { %3916 = vrcp.f32 %v1666_v4  ;;  %v1669_v46 = vpop.xlane.xlu0 %1668 }
 0x4f8   :  { %3918 = vrcp.f32 %v1669_v46  ;;  %3712 = vmatmul.mubr.msk.f32.vlgmr.msra.gmra.mxu1 %vm332_vm10, %v1707_v35 }
 0x4f9   :  { %v3909_v7 = vpop.eup %3908  ;;  %3720 = vmatpush3.msra.mxu1 %v1876_v32  ;;  %3721 = vmatprep.mubr.msk.f32.mxu1 %vm4003_vm9, %v4002_v36 }
 0x4fa   :  { %v3911_v27 = vpop.eup %3910  ;;  %v1672_v50 = vpop.xlane.xlu1 %1671  ;;  %3729 = vmatprep.subr.mxu1 %v4002_v36  ;;  %v1709_v34 = vmul.f32 %v3909_v7, %v4442_v58 }
 0x4fb   :  { %3920 = vrcp.f32 %v1672_v50  ;;  %v1675_v28 = vpop.xlane.xlu0 %1674  ;;  %v1712_v29 = vmul.f32 %v3911_v27, %v4446_v11 }
 0x4fc   :  { %3922 = vrcp.f32 %v1675_v28  ;;  %3722 = vmatmul.mubr.msk.f32.vlgmr.msra.gmra.mxu1 %vm332_vm10, %v1709_v34 }
 0x4fd   :  { %v3913_v37 = vpop.eup %3912  ;;  %3730 = vmatpush3.msra.mxu1 %v4499_v56  ;;  %3737 = vmatmul.mubr.msk.f32.vlgmr.msra.gmra.mxu0 %vm332_vm10, %v1712_v29 }
 0x4fe   :  { %3745 = vmatpush3.msra.mxu0 %v4509_v59  ;;  %3731 = vmatprep.mubr.msk.f32.mxu1 %vm4003_vm9, %v4002_v36  ;;  %v1711_v31 = vmul.f32 %v3913_v37, %v4454_v18 }
 0x4ff   :  { %3739 = vmatprep.subr.mxu1 %v4002_v36  ;;  %v1681_v58 = vpop.xlane.xlu0 %1680  ;;  %3746 = vmatprep.mubr.msk.f32.mxu0 %vm4003_vm9, %v4002_v36 }
 0x500   :  { %3924 = vrcp.f32 %v1681_v58  ;;  %3732 = vmatmul.mubr.msk.f32.vlgmr.msra.gmra.mxu1 %vm332_vm10, %v1711_v31  ;;  %3754 = vmatprep.subr.mxu0 %v4002_v36 }
 0x501   :  { %v3915_v30 = vpop.eup %3914  ;;  %3740 = vmatpush3.msra.mxu1 %v4507_v55  ;;  %3741 = vmatprep.mubr.msk.f32.mxu1 %vm4003_vm9, %v4002_v36 }
 0x502   :  { %3749 = vmatprep.subr.mxu1 %v4002_v36  ;;  %v1713_v11 = vmul.f32 %v3915_v30, %v4459_v33 }
 0x503   :  { %v2636_v39 = vpop.permute.xlu0 %2635 }
 0x504   :  { %v3917_v18 = vpop.eup %3916  ;;  %3742 = vmatmul.mubr.msk.f32.vlgmr.msra.gmra.mxu1 %vm332_vm10, %v1713_v11 }
 0x505   :  { %v3919_v40 = vpop.eup %3918  ;;  %3750 = vmatpush3.msra.mxu1 %v4511_v45  ;;  %v1714_v44 = vmul.f32 %v3917_v18, %v4464_v42  ;;  %3751 = vmatprep.mubr.msk.f32.mxu1 %vm4003_vm9, %v4002_v36 }
 0x506   :  { %3759 = vmatprep.subr.mxu1 %v4002_v36  ;;  %v1715_v60 = vmul.f32 %v3919_v40, %v4466_v41 }
 0x507   :  { %3747 = vmatmul.mubr.msk.f32.vlgmr.msra.gmra.mxu0 %vm332_vm10, %v1714_v44  ;;  %v2712_v9 = vpop.permute.xlu0 %2711 }
 0x508   :  { %v3921_v8 = vpop.eup %3920  ;;  %3755 = vmatpush3.msra.mxu0 %v4514_v61  ;;  %3752 = vmatmul.mubr.msk.f32.vlgmr.msra.gmra.mxu1 %vm332_vm10, %v1715_v60 }
 0x509   :  { %v3923_v33 = vpop.eup %3922  ;;  %3760 = vmatpush3.msra.mxu1 %v4532_v12  ;;  %3756 = vmatprep.mubr.msk.f32.mxu0 %vm4003_vm9, %v4002_v36  ;;  %v1716_v42 = vmul.f32 %v3921_v8, %v4472_v10 }
 0x50a   :  { %3761 = vmatprep.mubr.msk.f32.mxu1 %vm4003_vm9, %v4002_v36  ;;  %3769 = vmatprep.subr.mxu1 %v4002_v36  ;;  %v1717_v41 = vmul.f32 %v3923_v33, %v4475_v1  ;;  %v1678_v1 = vpop.xlane.xlu1 %1677 }
 0x50b   :  { %3757 = vmatmul.mubr.msk.f32.vlgmr.msra.gmra.mxu0 %vm332_vm10, %v1716_v42  ;;  %3764 = vmatprep.subr.mxu0 %v4002_v36  ;;  %v2788_v15 = vpop.permute.xlu0 %2787  ;;  %3926 = vrcp.f32 %v1678_v1 }
 0x50c   :  { %3762 = vmatmul.mubr.msk.f32.vlgmr.msra.gmra.mxu1 %vm332_vm10, %v1717_v41  ;;  %3766 = vmatprep.mubr.msk.f32.mxu0 %vm4003_vm9, %v4002_v36 }
 0x50d   :  { %v3925_v14 = vpop.eup %3924  ;;  %3770 = vmatpush3.msra.mxu1 %v2636_v39  ;;  %3771 = vmatprep.mubr.msk.f32.mxu1 %vm4003_vm9, %v4002_v36 }
 0x50e   :  { %3779 = vmatprep.subr.mxu1 %v4002_v36  ;;  %v1719_v10 = vmul.f32 %v3925_v14, %v4483_v22  ;;  %v1684_v23 = vpop.xlane.xlu1 %1683 }
 0x50f   :  { %3928 = vrcp.f32 %v1684_v23  ;;  %v2864_v55 = vpop.permute.xlu0 %2863 }
 0x510   :  { %3772 = vmatmul.mubr.msk.f32.vlgmr.msra.gmra.mxu1 %vm332_vm10, %v1719_v10 }
 0x511   :  { %3780 = vmatpush3.msra.mxu1 %v2788_v15  ;;  %3781 = vmatprep.mubr.msk.f32.mxu1 %vm4003_vm9, %v4002_v36 }
 0x512   :  { %v1690_v24 = vpop.xlane.xlu1 %1689 }
 0x513   :  { %3930 = vrcp.f32 %v1690_v24  ;;  %v3016_v49 = vpop.permute.xlu0 %3015 }
 0x514   :  { %3789 = vmatprep.subr.mxu1 %v3016_v49 }
 0x518   :  { %v3927_v26 = vpop.eup %3926 }
 0x519   :  { %v1718_v52 = vmul.f32 %v3927_v26, %v4481_v20 }
 0x51c   :  { %v3929_v22 = vpop.eup %3928 }
 0x51d   :  { %v1720_v56 = vmul.f32 %v3929_v22, %v4489_v25 }
 0x520   :  { %v3931_v54 = vpop.eup %3930 }
 0x521   :  { %v1722_v20 = vmul.f32 %v3931_v54, %v4493_v16  ;;  %v3010_v16 = vpop.permute.xlu0 %3009 }
 0x54f   :  { %v1687_v43 = vpop.xlane.xlu1 %1686 }
 0x550   :  { %3932 = vrcp.f32 %v1687_v43 }
 0x553   :  { %v2560_v32 = vpop.permute.xlu1 %2559 }
 0x554   :  { %3765 = vmatpush3.msra.mxu0 %v2560_v32 }
 0x555   :  { %3767 = vmatmul.mubr.msk.f32.vlgmr.msra.gmra.mxu0 %vm332_vm10, %v1718_v52  ;;  %3774 = vmatprep.subr.mxu0 %v4002_v36 }
 0x556   :  { %3775 = vmatpush3.msra.mxu0 %v2712_v9  ;;  %3776 = vmatprep.mubr.msk.f32.mxu0 %vm4003_vm9, %v4002_v36 }
 0x557   :  { %3784 = vmatprep.subr.mxu0 %v4002_v36  ;;  %v3014_v61 = vpop.permute.xlu1 %3013 }
 0x559   :  { %3777 = vmatmul.mubr.msk.f32.vlgmr.msra.gmra.mxu0 %vm332_vm10, %v1720_v56 }
 0x55a   :  { %3785 = vmatpush3.msra.mxu0 %v2864_v55  ;;  %3786 = vmatprep.mubr.msk.f32.mxu0 %vm4003_vm9, %v4002_v36 }
 0x55b   :  { %v3012_v36 = vpop.permute.xlu1 %3011 }
 0x55d   :  { %v3933_v13 = vpop.eup %3932  ;;  %3787 = vmatmul.mubr.msk.f32.vlgmr.msra.gmra.mxu0 %vm332_vm10, %v1722_v20  ;;  %v3003_v20 = vsub.s32 1, %v4116_v48 }
 0x55e   :  { %v1721_v59 = vmul.f32 %v3933_v13, %v4526_v6  ;;  %v4636_v13 = vld [vmem:[%s4760_s5] sm:$0xff] }
 0x560   :  { %3782 = vmatmul.mubr.msk.f32.vlgmr.msra.gmra.mxu1 %vm332_vm10, %v1721_v59  ;;  %v3004_v59 = vrot.slane %v4636_v13, %v3003_v20 }
 0x561   :  { %3790 = vmatpush3.msra.mxu1 %v3016_v49 }
 0x562   :  { %3791 = vmatprep.subr.mxu1 %v3014_v61 }
 0x563   :  { %3792 = vmatpush3.msra.mxu1 %v3014_v61 }
 0x564   :  { %3793 = vmatprep.subr.mxu1 %v3012_v36 }
 0x565   :  { %3794 = vmatpush3.msra.mxu1 %v3012_v36  ;;  %v3952_v36 = vld [vmem:[%s4755_s0] sm:$0xff] }
 0x566   :  { %3795 = vmatprep.subr.mxu1 %v3010_v16 }
 0x567   :  { %3796 = vmatpush3.msra.mxu1 %v3010_v16 }
 0x56f   :  { %v4606_v57 = vpop.f32.mrf.mxu0 }
 0x571   :  { %v3718_v25 = vpop.f32.mrf.mxu0 }
 0x573   :  { %v4608_v45 = vpop.f32.mrf.mxu0 }
 0x575   :  { %v3728_v0 = vpop.f32.mrf.mxu0 }
 0x5b8   :  { %v1795_v47 = vpop.f32.mrf.mxu1 }
 0x5ba   :  { %v3713_v51 = vpop.f32.mrf.mxu1 }
 0x5bc   :  { %v1947_v62 = vpop.f32.mrf.mxu1 }
 0x5bd   :  { %v2175_v5 = vpop.f32.mrf.mxu0 }
 0x5be   :  { %2945 = vrot.lane.b32.xlu0 %v2175_v5, %s4009_s24  ;;  %v3723_v38 = vpop.f32.mrf.mxu1 }
 0x5bf   :  { %v3738_v6 = vpop.f32.mrf.mxu0 }
 0x5c0   :  { %v2099_v63 = vpop.f32.mrf.mxu1 }
 0x5c2   :  { %2943 = vrot.lane.b32.xlu0 %v2099_v63, %s4009_s24  ;;  %v3733_v12 = vpop.f32.mrf.mxu1  ;;  %v3953_v63 = vld [vmem:[%s4755_s0 + $0x10] sm:$0xff] }
 0x5c4   :  { %v2251_v53 = vpop.f32.mrf.mxu1 }
 0x5c6   :  { %2947 = vrot.lane.b32.xlu0 %v2251_v53, %s4009_s24  ;;  %v3743_v2 = vpop.f32.mrf.mxu1  ;;  %v3954_v53 = vld [vmem:[%s4755_s0 + $0x18] sm:$0xff] }
 0x5c7   :  { %v2327_v3 = vpop.f32.mrf.mxu0 }
 0x5c8   :  { %2949 = vrot.lane.b32.xlu1 %v2327_v3, %s4009_s24  ;;  %v2403_v19 = vpop.f32.mrf.mxu1 }
 0x5c9   :  { %v3748_v17 = vpop.f32.mrf.mxu0 }
 0x5ca   :  { %v3753_v21 = vpop.f32.mrf.mxu1 }
 0x5cb   :  { %v2479_v4 = vpop.f32.mrf.mxu0 }
 0x5cc   :  { %2961 = vrot.lane.b32.xlu0 %v2479_v4, %s4010_s25  ;;  %2959 = vrot.lane.b32.xlu1 %v2403_v19, %s4010_s25  ;;  %v2555_v35 = vpop.f32.mrf.mxu1 }
 0x5cd   :  { %v3758_v46 = vpop.f32.mrf.mxu0 }
 0x5ce   :  { %v3763_v7 = vpop.f32.mrf.mxu1 }
 0x5d0   :  { %2963 = vrot.lane.b32.xlu0 %v2555_v35, %s4010_s25  ;;  %v2707_v27 = vpop.f32.mrf.mxu1 }
 0x5d2   :  { %v3773_v50 = vpop.f32.mrf.mxu1 }
 0x615   :  { %v2631_v34 = vpop.f32.mrf.mxu0 }
 0x617   :  { %v3768_v28 = vpop.f32.mrf.mxu0 }
 0x619   :  { %v2783_v29 = vpop.f32.mrf.mxu0 }
 0x61a   :  { %2977 = vrot.lane.b32.xlu1 %v2783_v29, %s4011_s26 }
 0x61b   :  { %v3778_v37 = vpop.f32.mrf.mxu0 }
 0x61d   :  { %v2935_v31 = vpop.f32.mrf.mxu0 }
 0x61e   :  { %2975 = vrot.lane.b32.xlu1 %v2707_v27, %s4011_s26 }
 0x61f   :  { %v3788_v58 = vpop.f32.mrf.mxu0 }
 0x620   :  { %v2859_v30 = vpop.f32.mrf.mxu1 }
 0x621   :  { %2979 = vrot.lane.b32.xlu0 %v2859_v30, %s4011_s26 }
 0x622   :  { %2965 = vrot.lane.b32.xlu1 %v2631_v34, %s4010_s25  ;;  %v3783_v11 = vpop.f32.mrf.mxu1 }
 0x626   :  { %2981 = vrot.lane.b32.xlu1 %v2935_v31, %s4011_s26 }
 0x630   :  { %v2946_v18 = vpop.permute.xlu0 %2945 }
 0x631   :  { %v2988_v41 = vsel %vm332_vm10, %v4606_v57, %v2946_v18 }
 0x634   :  { %v2944_v39 = vpop.permute.xlu0 %2943 }
 0x635   :  { %v2987_v42 = vsel %vm332_vm10, %v1795_v47, %v2944_v39 }
 0x638   :  { %v2948_v44 = vpop.permute.xlu0 %2947 }
 0x639   :  { %v2989_v23 = vsel %vm332_vm10, %v1947_v62, %v2948_v44 }
 0x63a   :  { %v2950_v40 = vpop.permute.xlu1 %2949 }
 0x63b   :  { %v2990_v22 = vsel %vm332_vm10, %v4608_v45, %v2950_v40  ;;  %v3951_v45 = vld [vmem:[%s4755_s0 + $0x8] sm:$0xff] }
 0x63e   :  { %v2960_v60 = vpop.permute.xlu1 %2959  ;;  %v2962_v8 = vpop.permute.xlu0 %2961 }
 0x63f   :  { %v2992_v14 = vsel %vm2991_vm11, %v2987_v42, %v2960_v60  ;;  %v2993_v15 = vsel %vm2991_vm11, %v2988_v41, %v2962_v8  ;;  %v47_v60 = vld [vmem:[%s4758_s3 + $0x18] sm:$0xff]  ;;  %v46_v8 = vld [vmem:[%s4758_s3 + $0x10] sm:$0xff]  ;;  %v44_v42 = vld [vmem:[%s4758_s3] sm:$0xff] }
 0x640   :  { %3803 = vmatprep.subr.mxu0 %v47_v60  ;;  %v54_v41 = vld [vmem:[%s4759_s4 + $0x30] sm:$0xff] }
 0x641   :  { %3804 = vmatpush3.msra.mxu0 %v47_v60 }
 0x642   :  { %v2964_v9 = vpop.permute.xlu0 %2963  ;;  %3805 = vmatprep.subr.mxu0 %v46_v8 }
 0x643   :  { %v2994_v43 = vsel %vm2991_vm11, %v2989_v23, %v2964_v9  ;;  %3806 = vmatpush3.msra.mxu0 %v46_v8  ;;  %v55_v9 = vld [vmem:[%s4759_s4 + $0x38] sm:$0xff] }
 0x644   :  { %3817 = vmatprep.subr.mxu1 %v55_v9 }
 0x68c   :  { %v2978_v33 = vpop.permute.xlu1 %2977 }
 0x68d   :  { %v2998_v24 = vsel %vm2996_vm12, %v2993_v15, %v2978_v33  ;;  %v45_v33 = vld [vmem:[%s4758_s3 + $0x8] sm:$0xff] }
 0x68e   :  { %3807 = vmatprep.subr.mxu0 %v45_v33 }
 0x68f   :  { %3808 = vmatpush3.msra.mxu0 %v45_v33 }
 0x690   :  { %v2976_v10 = vpop.permute.xlu1 %2975  ;;  %3809 = vmatprep.subr.mxu0 %v44_v42 }
 0x691   :  { %v2997_v1 = vsel %vm2996_vm12, %v2992_v14, %v2976_v10  ;;  %3810 = vmatpush3.msra.mxu0 %v44_v42  ;;  %v53_v14 = vld [vmem:[%s4759_s4 + $0x28] sm:$0xff]  ;;  %v52_v10 = vld [vmem:[%s4759_s4 + $0x20] sm:$0xff] }
 0x692   :  { %3797 = vmatprep.mubr.msk.f32.mxu1 %vm103_vm0, %v2997_v1 }
 0x693   :  { %3798 = vmatmul.mubr.msk.f32.vlgmr.msra.gmra.mxu1 %vm103_vm0, %v2998_v24  ;;  %v2980_v26 = vpop.permute.xlu0 %2979 }
 0x694   :  { %v2999_v32 = vsel %vm2996_vm12, %v2994_v43, %v2980_v26  ;;  %v2966_v52 = vpop.permute.xlu1 %2965  ;;  %3818 = vmatpush3.msra.mxu1 %v55_v9  ;;  %v50_v9 = vld [vmem:[%s4759_s4 + $0x10] sm:$0xff] }
 0x695   :  { %3800 = vmatprep.mubr.msk.f32.mxu1 %vm103_vm0, %v2999_v32  ;;  %v2995_v56 = vsel %vm2991_vm11, %v2990_v22, %v2966_v52  ;;  %3819 = vmatprep.subr.mxu1 %v54_v41 }
 0x696   :  { %3820 = vmatpush3.msra.mxu1 %v54_v41  ;;  %v48_v41 = vld [vmem:[%s4759_s4] sm:$0xff] }
 0x697   :  { %3821 = vmatprep.subr.mxu1 %v53_v14 }
 0x698   :  { %v2982_v54 = vpop.permute.xlu1 %2981  ;;  %3822 = vmatpush3.msra.mxu1 %v53_v14  ;;  %v3220_v14 = vsub.s32 2, %v4116_v48 }
 0x699   :  { %v3000_v55 = vsel %vm2996_vm12, %v2995_v56, %v2982_v54  ;;  %3823 = vmatprep.subr.mxu1 %v52_v10 }
 0x69a   :  { %3801 = vmatmul.mubr.msk.f32.gmra.mxu1 %vm103_vm0, %v3000_v55 }
 0x69b   :  { %3824 = vmatpush3.msra.mxu1 %v52_v10  ;;  %v3221_v10 = vrot.slane %v4636_v13, %v3220_v14 }
 0x753   :  { %v3799_v57 = vpop.f32.mrf.mxu1 }
 0x754   :  { %v3105_v25 = vadd.f32 %v3799_v57, %v3004_v59 }
 0x755   :  { %v3099_v0 = vpop.f32.mrf.mxu1 }
 0x756   :  { %v4642_v49 = vadd.f32 %v3951_v45, %v3105_v25  ;;  %v3100_v61 = vadd.f32 %v3099_v0, %v3004_v59 }
 0x758   :  { %v4647_v16 = vadd.f32 %v3952_v36, %v3100_v61  ;;  %v3125_v47 = vsel %vm103_vm0, %v4642_v49, 0.0 }
 0x759   :  { %3126 = vadd.xlane.f32.xlu1 %v3125_v47 }
 0x75a   :  { %v3802_v51 = vpop.f32.mrf.mxu1  ;;  %v3122_v62 = vsel %vm103_vm0, %v4647_v16, 0.0 }
 0x75b   :  { %3123 = vadd.xlane.f32.xlu0 %v3122_v62  ;;  %v3115_v38 = vadd.f32 %v3802_v51, %v3004_v59 }
 0x75c   :  { %v3109_v5 = vpop.f32.mrf.mxu1 }
 0x75d   :  { %v3110_v6 = vadd.f32 %v3109_v5, %v3004_v59  ;;  %v4661_v2 = vadd.f32 %v3954_v53, %v3115_v38 }
 0x75f   :  { %v4656_v12 = vadd.f32 %v3953_v63, %v3110_v6  ;;  %v3131_v19 = vsel %vm103_vm0, %v4661_v2, 0.0  ;;  %v3200_v6 = vsub.s32 6, %v4116_v48 }
 0x761   :  { %v3128_v3 = vsel %vm103_vm0, %v4656_v12, 0.0 }
 0x762   :  { %3129 = vadd.xlane.f32.xlu0 %v3128_v3 }
 0x766   :  { %3132 = vadd.xlane.f32.xlu0 %v3131_v19 }
 0x7e2   :  { %v3127_v17 = vpop.xlane.xlu1 %3126 }
 0x7e3   :  { %v3135_v21 = vmul.f32 0.03125, %v3127_v17 }
 0x7e4   :  { %v3124_v4 = vpop.xlane.xlu0 %3123 }
 0x7e5   :  { %v4668_v35 = vsub.f32 %v4642_v49, %v3135_v21  ;;  %v3134_v46 = vmul.f32 0.03125, %v3124_v4  ;;  %v3201_v21 = vrot.slane %v4636_v13, %v3200_v6 }
 0x7e7   :  { %v4671_v7 = vsub.f32 %v4647_v16, %v3134_v46  ;;  %v3143_v27 = vmul.f32 %v4668_v35, %v4668_v35 }
 0x7e9   :  { %v3149_v50 = vsel %vm103_vm0, %v3143_v27, 0.0  ;;  %v3142_v34 = vmul.f32 %v4671_v7, %v4671_v7  ;;  %v3212_v27 = vsub.s32 7, %v4116_v48 }
 0x7ea   :  { %3150 = vadd.xlane.f32.xlu0 %v3149_v50 }
 0x7eb   :  { %v3130_v28 = vpop.xlane.xlu0 %3129  ;;  %v3146_v29 = vsel %vm103_vm0, %v3142_v34, 0.0  ;;  %v3203_v34 = vmul.f32 %v3201_v21, %v4668_v35 }
 0x7ec   :  { %v3136_v37 = vmul.f32 0.03125, %v3130_v28  ;;  %3147 = vadd.xlane.f32.xlu1 %v3146_v29  ;;  %v3202_v28 = vmul.f32 %v3201_v21, %v4671_v7 }
 0x7ee   :  { %v4680_v31 = vsub.f32 %v4656_v12, %v3136_v37  ;;  %v3213_v37 = vrot.slane %v4636_v13, %v3212_v27 }
 0x7ef   :  { %v3133_v58 = vpop.xlane.xlu0 %3132 }
 0x7f0   :  { %v3137_v30 = vmul.f32 0.03125, %v3133_v58  ;;  %v3144_v11 = vmul.f32 %v4680_v31, %v4680_v31 }
 0x7f2   :  { %v4685_v18 = vsub.f32 %v4661_v2, %v3137_v30  ;;  %v3152_v39 = vsel %vm103_vm0, %v3144_v11, 0.0 }
 0x7f3   :  { %3153 = vadd.xlane.f32.xlu1 %v3152_v39 }
 0x7f4   :  { %v3145_v40 = vmul.f32 %v4685_v18, %v4685_v18  ;;  %v3205_v8 = vmul.f32 %v3201_v21, %v4685_v18  ;;  %v49_v18 = vld [vmem:[%s4759_s4 + $0x8] sm:$0xff] }
 0x7f6   :  { %v3155_v44 = vsel %vm103_vm0, %v3145_v40, 0.0  ;;  %v3204_v40 = vmul.f32 %v3201_v21, %v4680_v31  ;;  %v51_v31 = vld [vmem:[%s4759_s4 + $0x18] sm:$0xff]  ;;  %s4012_s4 = smov [#allocation5]  }
 0x7f7   :  { %3156 = vadd.xlane.f32.xlu0 %v3155_v44  ;;  %3825 = vmatprep.subr.mxu1 %v51_v31  ;;  %s3438_s5 = sshll.u32 %s4012_s4, 4  ;;  %s3439_s5 = int_to_ptr.vmem [resolvable:$true] %s3438_s5 }
 0x7f8   :  { %3826 = vmatpush3.msra.mxu1 %v51_v31  ;;  %s3975_s8 = scalar_lea.vmem %s3439_s5, 512  ;;  %p3980_p6 = scmp.lt.s32.totalorder %s3439_s5, %s3439_s5 }
 0x7f9   :  { %3827 = vmatprep.subr.mxu1 %v50_v9  ;;  %p3976_p5 = scmp.ne.s32.totalorder %s3439_s5, %s3975_s8  ;;  %p3981_p7 = scmp.lt.s32.totalorder %s3975_s8, %s3975_s8 }
 0x7fa   :  { %3828 = vmatpush3.msra.mxu1 %v50_v9 }
 0x7fb   :  { %3829 = vmatprep.subr.mxu1 %v49_v18  ;;  %p3982_p8 = por %p3981_p7, %p3980_p6 }
 0x7fc   :  { %3830 = vmatpush3.msra.mxu1 %v49_v18 }
 0x7fd   :  { %3831 = vmatprep.subr.mxu1 %v48_v41  ;;  %p3983_p9 = pnand %p3982_p8, %p3976_p5 }
 0x7fe   :  { %3832 = vmatpush3.msra.mxu1 %v48_v41 }
 0x873   :  { %v3151_v15 = vpop.xlane.xlu0 %3150 }
 0x874   :  { %v3159_v1 = vmul.f32 0.032258064, %v3151_v15 }
 0x875   :  { %v3148_v23 = vpop.xlane.xlu1 %3147 }
 0x876   :  { %3934 = vrsqrt.f32 %v3159_v1  ;;  %v3158_v24 = vmul.f32 0.032258064, %v3148_v23  ;;  %vm3171_vm13 = vcmp.eq.f32.partialorder %v3159_v1, inf  ;;  %v3174_v54 = vand.u32 2147483648, %v3159_v1 }
 0x877   :  { %vm3173_vm14 = vcmp.eq.f32.partialorder %v3159_v1, 0.0 }
 0x878   :  { %3936 = vrsqrt.f32 %v3158_v24  ;;  %vm3164_vm15 = vcmp.eq.f32.partialorder %v3158_v24, inf  ;;  %v3167_v0 = vand.u32 2147483648, %v3158_v24  ;;  %vm3166_vm1 = vcmp.eq.f32.partialorder %v3158_v24, 0.0 }
 0x87c   :  { %v3154_v43 = vpop.xlane.xlu1 %3153 }
 0x87d   :  { %v3160_v26 = vmul.f32 0.032258064, %v3154_v43 }
 0x87f   :  { %3938 = vrsqrt.f32 %v3160_v26  ;;  %vm3178_vm2 = vcmp.eq.f32.partialorder %v3160_v26, inf  ;;  %v3181_v62 = vand.u32 2147483648, %v3160_v26  ;;  %vm3180_vm3 = vcmp.eq.f32.partialorder %v3160_v26, 0.0 }
 0x880   :  { %v3157_v32 = vpop.xlane.xlu0 %3156 }
 0x881   :  { %v3161_v52 = vmul.f32 0.032258064, %v3157_v32 }
 0x883   :  { %v3935_v22 = vpop.eup %3934  ;;  %3940 = vrsqrt.f32 %v3161_v52  ;;  %vm3185_vm4 = vcmp.eq.f32.partialorder %v3161_v52, inf  ;;  %v3188_v19 = vand.u32 2147483648, %v3161_v52  ;;  %vm3187_vm5 = vcmp.eq.f32.partialorder %v3161_v52, 0.0 }
 0x884   :  { %v3170_v56 = vmul.f32 %v3935_v22, %v3159_v1 }
 0x885   :  { %v3937_v55 = vpop.eup %3936 }
 0x886   :  { %v3172_v20 = vsel %vm3171_vm13, %v3159_v1, %v3170_v56  ;;  %v3163_v57 = vmul.f32 %v3937_v55, %v3158_v24 }
 0x887   :  { %v3175_v59 = vsel %vm3173_vm14, %v3174_v54, %v3172_v20  ;;  %v3325_v20 = vsub.s32 3, %v4116_v48 }
 0x888   :  { %v3191_v25 = vadd.f32 1e-06, %v3175_v59  ;;  %v3165_v45 = vsel %vm3164_vm15, %v3158_v24, %v3163_v57 }
 0x889   :  { %v3168_v61 = vsel %vm3166_vm1, %v3167_v0, %v3165_v45  ;;  %v3326_v59 = vrot.slane %v4636_v13, %v3325_v20 }
 0x88a   :  { %3942 = vrcp.f32 %v3191_v25  ;;  %v3190_v36 = vadd.f32 1e-06, %v3168_v61 }
 0x88c   :  { %v3939_v47 = vpop.eup %3938  ;;  %3944 = vrcp.f32 %v3190_v36 }
 0x88d   :  { %v3177_v51 = vmul.f32 %v3939_v47, %v3160_v26 }
 0x88f   :  { %v3179_v5 = vsel %vm3178_vm2, %v3160_v26, %v3177_v51 }
 0x890   :  { %v3941_v38 = vpop.eup %3940  ;;  %v3182_v63 = vsel %vm3180_vm3, %v3181_v62, %v3179_v5 }
 0x891   :  { %v3192_v53 = vadd.f32 1e-06, %v3182_v63  ;;  %v3184_v3 = vmul.f32 %v3941_v38, %v3161_v52 }
 0x893   :  { %3946 = vrcp.f32 %v3192_v53  ;;  %v3186_v17 = vsel %vm3185_vm4, %v3161_v52, %v3184_v3 }
 0x894   :  { %v3189_v4 = vsel %vm3187_vm5, %v3188_v19, %v3186_v17 }
 0x895   :  { %v3193_v46 = vadd.f32 1e-06, %v3189_v4 }
 0x897   :  { %v3943_v50 = vpop.eup %3942  ;;  %3948 = vrcp.f32 %v3193_v46 }
 0x898   :  { %v3207_v58 = vmul.f32 %v3943_v50, %v3203_v34 }
 0x899   :  { %v3945_v29 = vpop.eup %3944 }
 0x89a   :  { %v3206_v30 = vmul.f32 %v3945_v29, %v3202_v28  ;;  %v3215_v39 = vadd.f32 %v3213_v37, %v3207_v58 }
 0x89c   :  { %v3214_v11 = vadd.f32 %v3213_v37, %v3206_v30 }
 0x89e   :  { %3811 = vmatprep.mubr.msk.f32.mxu0 %vm103_vm0, %v3214_v11 }
 0x89f   :  { %3812 = vmatmul.mubr.msk.f32.vlgmr.msra.gmra.mxu0 %vm103_vm0, %v3215_v39 }
 0x8a0   :  { %v3947_v44 = vpop.eup %3946 }
 0x8a1   :  { %v3208_v60 = vmul.f32 %v3947_v44, %v3204_v40 }
 0x8a3   :  { %v3216_v35 = vadd.f32 %v3213_v37, %v3208_v60 }
 0x8a4   :  { %v3949_v33 = vpop.eup %3948 }
 0x8a5   :  { %3814 = vmatprep.mubr.msk.f32.mxu0 %vm103_vm0, %v3216_v35  ;;  %v3209_v7 = vmul.f32 %v3949_v33, %v3205_v8 }
 0x8a7   :  { %v3217_v42 = vadd.f32 %v3213_v37, %v3209_v7 }
 0x8a9   :  { %3815 = vmatmul.mubr.msk.f32.gmra.mxu0 %vm103_vm0, %v3217_v42 }
 0x95f   :  { %v3813_v15 = vpop.f32.mrf.mxu0 }
 0x960   :  { %v3306_v1 = vadd.f32 %v3813_v15, %v3221_v10 }
 0x961   :  { %v3300_v23 = vpop.f32.mrf.mxu0 }
 0x962   :  { %v3301_v24 = vadd.f32 %v3300_v23, %v3221_v10  ;;  %v3320_v26 = vmax.f32 %v3306_v1, 0.0 }
 0x964   :  { %v3319_v43 = vmax.f32 %v3301_v24, 0.0 }
 0x966   :  { %3833 = vmatprep.mubr.msk.f32.mxu1 %vm3327_vm6, %v3319_v43 }
 0x967   :  { %3834 = vmatmul.mubr.msk.f32.vlgmr.msra.gmra.mxu1 %vm3327_vm6, %v3320_v26 }
 0x969   :  { %v3816_v32 = vpop.f32.mrf.mxu0 }
 0x96a   :  { %v3316_v52 = vadd.f32 %v3816_v32, %v3221_v10 }
 0x96b   :  { %v3310_v22 = vpop.f32.mrf.mxu0 }
 0x96c   :  { %v3311_v56 = vadd.f32 %v3310_v22, %v3221_v10  ;;  %v3322_v55 = vmax.f32 %v3316_v52, 0.0 }
 0x96e   :  { %v3321_v54 = vmax.f32 %v3311_v56, 0.0 }
 0x970   :  { %3836 = vmatprep.mubr.msk.f32.mxu1 %vm3327_vm6, %v3321_v54 }
 0x971   :  { %3837 = vmatmul.mubr.msk.f32.gmra.mxu1 %vm3327_vm6, %v3322_v55 }
 0xa27   :  { %v3835_v57 = vpop.f32.mrf.mxu1 }
 0xa28   :  { %v3412_v25 = vadd.f32 %v3835_v57, %v3326_v59 }
 0xa29   :  { %v3406_v0 = vpop.f32.mrf.mxu1 }
 0xa2a   :  { %v3426_v45 = vadd.f32 %v3412_v25, %v4642_v49  ;;  %v3407_v61 = vadd.f32 %v3406_v0, %v3326_v59 }
 0xa2c   :  { %3430 = vst.msk [vmem:[#allocation5 + $0x8] sm:$0xff] %vm103_vm0, %v3426_v45  ;;  %v3425_v36 = vadd.f32 %v3407_v61, %v4647_v16 }
 0xa2e   :  { %3429 = vst.msk [vmem:[#allocation5] sm:$0xff] %vm103_vm0, %v3425_v36 }
 0xa31   :  { %v3838_v47 = vpop.f32.mrf.mxu1 }
 0xa32   :  { %v3422_v51 = vadd.f32 %v3838_v47, %v3326_v59 }
 0xa33   :  { %v3416_v62 = vpop.f32.mrf.mxu1 }
 0xa34   :  { %v3428_v48 = vadd.f32 %v3422_v51, %v4661_v2  ;;  %v3417_v13 = vadd.f32 %v3416_v62, %v3326_v59 }
 0xa36   :  { %3432 = vst.msk [vmem:[#allocation5 + $0x18] sm:$0xff] %vm103_vm0, %v3428_v48  ;;  %v3427_v5 = vadd.f32 %v3417_v13, %v4656_v12 }
 0xa38   :  { %3431 = vst.msk [vmem:[#allocation5 + $0x10] sm:$0xff] %vm103_vm0, %v3427_v5 }
 0xa39   :  { %3986 = shalt.err (!%p3983_p9)
}
 0xa3a   :  { %s4013_s9 = smov 128  }
 0xa3b   :  { %3444 = dma.vmem_to_hbm [thread:$0]  %s3439_s5, 512, %s4761_s6, [#allocation4], %s4013_s9, %s4013_s9, %s4009_s24  }
 0xa3c   :  { %3997 = dma.done.wait [#allocation4], 512  }
 0xa3d   :  { %3998 = vsyncadd [#allocation4], 4294966784 }
 0xa3e   :  { %3448 = vsyncpa [#allocation3], 1 }
 0xa3f   :  { %3449 = vsyncpa [#allocation4], 1 }

</bundles_post_ra>
